<compile_context>
chip_gen: v7x
topology: tpu7x:2x2x1
jax: 0.10.0
libtpu: 0.0.40
codegen_flags: <defaults>
</compile_context>

<pallas_src>
import functools
import math

import jax
import jax.numpy as jnp
from jax import lax
from jax.experimental import pallas as pl
from jax.experimental.pallas import tpu as pltpu

LN_EPS = 1e-5  # torch.nn.LayerNorm default eps


def _layer_norm(x, gamma, beta):
    mu = jnp.mean(x, axis=-1, keepdims=True)
    var = jnp.mean((x - mu) ** 2, axis=-1, keepdims=True)
    return (x - mu) * lax.rsqrt(var + LN_EPS) * gamma + beta


def _gelu(x):
    # BERT-style tanh approximation of GELU (matches the repo's GeLU module).
    return 0.5 * x * (1.0 + jnp.tanh(0.7978845608028654 * (x + 0.044715 * x * x * x)))


def _bce_with_logits(x, t):
    # numerically stable: max(x,0) - x*t + log(1+exp(-|x|))
    return jnp.maximum(x, 0.0) - x * t + jnp.log1p(jnp.exp(-jnp.abs(x)))


def _encoder_loss_kernel(n_heads,
                         seq_ref, pos_t_ref, neg_t_ref, mask_ref, posemb_ref,
                         ln0_ref, lnA_ref, wqkv_ref, bqkv_ref, wo_ref, bo_ref,
                         lnB_ref, w1_ref, b1_ref, w2_ref, b2_ref,
                         out_ref, x_scr, amask_scr):
    layer = pl.program_id(1)
    n_layers = pl.num_programs(1)
    BT, L, D = seq_ref.shape
    N = BT * L
    dh = D // n_heads
    scale = 1.0 / math.sqrt(dh)

    # ---- first layer step of each batch tile: embed + posemb + input LN, cache mask ----
    @pl.when(layer == 0)
    def _init():
        x0 = seq_ref[...] + posemb_ref[...][None, :, :]
        ln0 = ln0_ref[...]
        x_scr[...] = _layer_norm(x0.reshape(N, D), ln0[0], ln0[1])
        # additive mask: attend iff (key <= query) and log_mask[key] != 0
        logm = mask_ref[...]                                        # (BT, 1, L)
        q_idx = lax.broadcasted_iota(jnp.int32, (L, L), 0)
        k_idx = lax.broadcasted_iota(jnp.int32, (L, L), 1)
        allowed = (k_idx <= q_idx)[None, :, :] & (logm != 0.0)      # (BT, L, L)
        amask_scr[...] = jnp.where(allowed, 0.0, -1e9)
        # dropout(drop_rate=0) -> identity everywhere

    x = x_scr[...]               # (N, D) f32 residual stream for this batch tile
    add_mask = amask_scr[...]    # (BT, L, L) f32 cached additive mask

    lnA = lnA_ref[0]             # (2, D)  gamma/beta
    lnB = lnB_ref[0]
    wqkv = wqkv_ref[0]           # (D, 3D) bf16 (fused Q|K|V)
    bqkv = bqkv_ref[0]           # (1, 3D) f32
    wo = wo_ref[0]               # (D, D)  bf16
    bo = bo_ref[0]               # (1, D)  f32
    w1 = w1_ref[0]               # (D, 4D) bf16
    b1 = b1_ref[0]               # (1, 4D) f32
    w2 = w2_ref[0]               # (4D, D) bf16
    b2 = b2_ref[0]               # (1, D)  f32

    # --- multi-head self-attention (pre-LN SublayerConnection), fused QKV matmul ---
    h = _layer_norm(x, lnA[0], lnA[1]).astype(jnp.bfloat16)
    qkv = jnp.dot(h, wqkv, preferred_element_type=jnp.float32) + bqkv   # (N, 3D) f32
    qkv_bf = qkv.astype(jnp.bfloat16)                                   # cast once, slice per head
    attn = None
    for hh in range(n_heads):
        lo = hh * dh
        q_h = qkv_bf[:, lo:lo + dh].reshape(BT, L, dh)
        k_h = qkv_bf[:, D + lo:D + lo + dh].reshape(BT, L, dh)
        v_h = qkv_bf[:, 2 * D + lo:2 * D + lo + dh].reshape(BT, L, dh)
        s = jnp.einsum("bqd,bkd->bqk", q_h, k_h,
                       preferred_element_type=jnp.float32) * scale + add_mask
        s = s - jnp.max(s, axis=-1, keepdims=True)                      # f32 softmax
        e = jnp.exp(s)
        p = e * pl.reciprocal(jnp.sum(e, axis=-1, keepdims=True), approx=True)
        ctx = jnp.einsum("bqk,bkd->bqd", p.astype(jnp.bfloat16), v_h,
                         preferred_element_type=jnp.float32)            # (BT, L, dh)
        # concat-free head merge: attn_out = sum_h ctx_h @ W_o[h*dh:(h+1)*dh, :]
        contrib = jnp.dot(ctx.reshape(N, dh).astype(jnp.bfloat16),
                          wo[lo:lo + dh, :],
                          preferred_element_type=jnp.float32)
        attn = contrib if attn is None else attn + contrib
    x = x + attn + bo            # residual (dropout = identity)

    # --- position-wise feed-forward (pre-LN SublayerConnection) ---
    h2 = _layer_norm(x, lnB[0], lnB[1]).astype(jnp.bfloat16)
    f = _gelu(jnp.dot(h2, w1, preferred_element_type=jnp.float32) + b1)
    f = jnp.dot(f.astype(jnp.bfloat16), w2, preferred_element_type=jnp.float32) + b2
    x = x + f                    # residual (dropout = identity)
    x_scr[...] = x

    # ---- last layer step: fused BCE-with-logits partial sums for this batch tile ----
    @pl.when(layer == n_layers - 1)
    def _epilogue():
        prec = x.reshape(BT, L, D)
        pos_sc = jnp.sum(prec * pos_t_ref[...], axis=-1)             # (BT, L)
        neg_sc = jnp.sum(prec * neg_t_ref[...], axis=-1)             # (BT, L)
        m = (mask_ref[...].reshape(BT, L) != 0.0).astype(jnp.float32)
        pos_part = jnp.sum(m * _bce_with_logits(pos_sc, 1.0))
        neg_part = jnp.sum(m * _bce_with_logits(neg_sc, 0.0))
        cnt = jnp.sum(m)
        # lane-dense (8,128) output: row0=pos sum, row1=neg sum, row2=mask count
        row = lax.broadcasted_iota(jnp.int32, (8, 128), 0)
        outv = (jnp.where(row == 0, pos_part, 0.0)
                + jnp.where(row == 1, neg_part, 0.0)
                + jnp.where(row == 2, cnt, 0.0))
        out_ref[...] = outv.reshape(1, 8, 128)


def _pick_batch_tile(B, L):
    # aim for ~512 flattened rows per grid step (feeds the MXU), bounded by batch
    target = max(1, 512 // max(L, 1))
    bt = min(B, target)
    while B % bt:
        bt -= 1
    return bt


def fused_encoder_bce(params, seq_in, pos_t, neg_t, log_mask, n_heads):
    B, L, D = seq_in.shape
    n_layers = params["wqkv"].shape[0]
    BT = _pick_batch_tile(B, L)
    nbt = B // BT
    mask3 = log_mask.reshape(B, 1, L).astype(jnp.float32)

    def batch_blk(shape):
        return pl.BlockSpec(shape, lambda b, l: (b, 0, 0))

    def const_blk(shape):
        nd = len(shape)
        return pl.BlockSpec(shape, lambda b, l: (0,) * nd)

    def layer_blk(shape):
        # stream one layer's weights per grid step along the (arbitrary) layer axis
        nd = len(shape)
        return pl.BlockSpec((1,) + tuple(shape[1:]),
                            lambda b, l: (l,) + (0,) * (nd - 1))

    kernel = functools.partial(_encoder_loss_kernel, n_heads)
    partials = pl.pallas_call(
        kernel,
        out_shape=jax.ShapeDtypeStruct((nbt, 8, 128), jnp.float32),
        grid=(nbt, n_layers),
        in_specs=[
            batch_blk((BT, L, D)),                 # input sequence embeddings
            batch_blk((BT, L, D)),                 # positive targets
            batch_blk((BT, L, D)),                 # negative targets
            batch_blk((BT, 1, L)),                 # log_mask
            const_blk(params["pos_emb"].shape),
            const_blk(params["ln0"].shape),
            layer_blk(params["lnA"].shape),
            layer_blk(params["wqkv"].shape),
            layer_blk(params["bqkv"].shape),
            layer_blk(params["wo"].shape),
            layer_blk(params["bo"].shape),
            layer_blk(params["lnB"].shape),
            layer_blk(params["w1"].shape),
            layer_blk(params["b1"].shape),
            layer_blk(params["w2"].shape),
            layer_blk(params["b2"].shape),
        ],
        out_specs=pl.BlockSpec((1, 8, 128), lambda b, l: (b, 0, 0)),
        scratch_shapes=[
            pltpu.VMEM((BT * L, D), jnp.float32),   # residual stream accumulator
            pltpu.VMEM((BT, L, L), jnp.float32),    # cached additive attention mask
        ],
        compiler_params=pltpu.CompilerParams(
            dimension_semantics=("parallel", "arbitrary"),
            vmem_limit_bytes=48 * 1024 * 1024),
    )(seq_in, pos_t, neg_t, mask3,
      params["pos_emb"], params["ln0"],
      params["lnA"], params["wqkv"], params["bqkv"], params["wo"], params["bo"],
      params["lnB"], params["w1"], params["b1"], params["w2"], params["b2"])

    pos_sum = jnp.sum(partials[:, 0, 0])
    neg_sum = jnp.sum(partials[:, 1, 0])
    n = jnp.maximum(jnp.sum(partials[:, 2, 0]), 1.0)   # guard all-padding batches
    # BCEWithLogitsLoss(mean over masked) applied to pos and neg, then summed.
    return pos_sum / n + neg_sum / n


def init_params(key, item_num, L, D, n_layers):
    ks = jax.random.split(key, 8)

    def xavier(k, shape):
        fan_in, fan_out = shape[-2], shape[-1]
        std = math.sqrt(2.0 / (fan_in + fan_out))
        return std * jax.random.normal(k, shape, dtype=jnp.float32)

    emb = xavier(ks[0], (item_num + 1, D))
    emb = emb.at[0].set(0.0)  # padding_idx=0

    ln_pair = jnp.stack([jnp.ones((D,), jnp.float32), jnp.zeros((D,), jnp.float32)])
    ln_stack = jnp.broadcast_to(ln_pair, (n_layers, 2, D))

    return dict(
        id_embedding=emb,                                             # f32
        pos_emb=xavier(ks[1], (L, D)),                                # f32
        ln0=ln_pair,                                                  # (2, D)
        lnA=ln_stack,                                                 # (nL, 2, D)
        lnB=ln_stack,
        wqkv=xavier(ks[2], (n_layers, D, 3 * D)).astype(jnp.bfloat16),  # fused Q|K|V
        bqkv=jnp.zeros((n_layers, 1, 3 * D), jnp.float32),
        wo=xavier(ks[3], (n_layers, D, D)).astype(jnp.bfloat16),
        bo=jnp.zeros((n_layers, 1, D), jnp.float32),
        w1=xavier(ks[4], (n_layers, D, 4 * D)).astype(jnp.bfloat16),
        b1=jnp.zeros((n_layers, 1, 4 * D), jnp.float32),
        w2=xavier(ks[5], (n_layers, 4 * D, D)).astype(jnp.bfloat16),
        b2=jnp.zeros((n_layers, 1, D), jnp.float32),
    )


def model_forward(params, sample_items, log_mask, n_heads):
    # Model.forward (use_modal=False): id-embedding gather (JAX glue) -> fused
    # Pallas transformer user-encoder + BCE-with-logits loss.
    # TODO(synk): use_modal=True branches (ResNet / ViT / MAE cv encoders) not implemented.
    B, L = log_mask.shape
    D = params["id_embedding"].shape[1]
    embs = jnp.take(params["id_embedding"], sample_items, axis=0)
    input_embs = embs.reshape(B, L + 1, 2, D)
    seq_in = input_embs[:, :-1, 0, :]   # input_embs[:, :, 0][:, :-1, :]
    pos_t = input_embs[:, 1:, 0, :]     # input_embs[:, :, 0][:, 1:, :]
    neg_t = input_embs[:, :-1, 1, :]    # input_embs[:, :, 1][:, :-1, :]
    return fused_encoder_bce(params, seq_in, pos_t, neg_t, log_mask, n_heads)


if __name__ == "__main__":
    B = 2               # batch
    L = 8               # args.max_seq_len
    D = 32              # args.embedding_dim
    n_layers = 2        # args.transformer_block
    n_heads = 2         # args.num_attention_heads
    item_num = 50       # drop_rate = 0.0 -> all dropouts are identity

    key = jax.random.PRNGKey(0)
    kp, ki = jax.random.split(key, 2)
    params = init_params(kp, item_num, L, D, n_layers)

    sample_items = jax.random.randint(ki, (B * (L + 1) * 2,), 1, item_num + 1,
                                      dtype=jnp.int32)
    # SASRec-style left-padded log_mask (zeros = padding)
    valid = jnp.array([5, 8], dtype=jnp.int32)
    log_mask = (jnp.arange(L)[None, :] >= (L - valid)[:, None]).astype(jnp.float32)

    fwd = jax.jit(functools.partial(model_forward, n_heads=n_heads))
    loss = fwd(params, sample_items, log_mask)
    loss = jax.block_until_ready(loss)
    assert loss.shape == () and bool(jnp.isfinite(loss))
    print("KERNEL_OK")
</pallas_src>

<mosaic_0001>
module attributes {stable_mosaic.version = 11 : i64} {
  func.func @_encoder_loss_kernel(%arg0: i32, %arg1: i32, %arg2: memref<2x8x32xf32, #tpu.memory_space<vmem>>, %arg3: memref<2x8x32xf32, #tpu.memory_space<vmem>>, %arg4: memref<2x8x32xf32, #tpu.memory_space<vmem>>, %arg5: memref<2x1x8xf32, #tpu.memory_space<vmem>>, %arg6: memref<8x32xf32, #tpu.memory_space<vmem>>, %arg7: memref<2x32xf32, #tpu.memory_space<vmem>>, %arg8: memref<1x2x32xf32, #tpu.memory_space<vmem>>, %arg9: memref<1x32x96xbf16, #tpu.memory_space<vmem>>, %arg10: memref<1x1x96xf32, #tpu.memory_space<vmem>>, %arg11: memref<1x32x32xbf16, #tpu.memory_space<vmem>>, %arg12: memref<1x1x32xf32, #tpu.memory_space<vmem>>, %arg13: memref<1x2x32xf32, #tpu.memory_space<vmem>>, %arg14: memref<1x32x128xbf16, #tpu.memory_space<vmem>>, %arg15: memref<1x1x128xf32, #tpu.memory_space<vmem>>, %arg16: memref<1x128x32xbf16, #tpu.memory_space<vmem>>, %arg17: memref<1x1x32xf32, #tpu.memory_space<vmem>>, %arg18: memref<1x8x128xf32, #tpu.memory_space<vmem>>, %arg19: memref<16x32xf32, #tpu.memory_space<vmem>>, %arg20: memref<2x8x8xf32, #tpu.memory_space<vmem>>) attributes {dimension_semantics = [#tpu.dimension_semantics<parallel>, #tpu.dimension_semantics<arbitrary>], iteration_bounds = array<i64: 1, 2>, scalar_prefetch = 0 : i64, scratch_operands = 2 : i64, tpu.core_type = #tpu.core_type<tc>, window_params = [{transform_indices = @transform_0, window_bounds = array<i64: 2, 8, 32>}, {transform_indices = @transform_1, window_bounds = array<i64: 2, 8, 32>}, {transform_indices = @transform_2, window_bounds = array<i64: 2, 8, 32>}, {transform_indices = @transform_3, window_bounds = array<i64: 2, 1, 8>}, {pipeline_mode = #tpu.pipeline_mode<synchronous>, transform_indices = @transform_4, window_bounds = array<i64: 8, 32>}, {pipeline_mode = #tpu.pipeline_mode<synchronous>, transform_indices = @transform_5, window_bounds = array<i64: 2, 32>}, {transform_indices = @transform_6, window_bounds = array<i64: 1, 2, 32>}, {transform_indices = @transform_7, window_bounds = array<i64: 1, 32, 96>}, {transform_indices = @transform_8, window_bounds = array<i64: 1, 1, 96>}, {transform_indices = @transform_9, window_bounds = array<i64: 1, 32, 32>}, {transform_indices = @transform_10, window_bounds = array<i64: 1, 1, 32>}, {transform_indices = @transform_11, window_bounds = array<i64: 1, 2, 32>}, {transform_indices = @transform_12, window_bounds = array<i64: 1, 32, 128>}, {transform_indices = @transform_13, window_bounds = array<i64: 1, 1, 128>}, {transform_indices = @transform_14, window_bounds = array<i64: 1, 128, 32>}, {transform_indices = @transform_15, window_bounds = array<i64: 1, 1, 32>}, {transform_indices = @transform_16, window_bounds = array<i64: 1, 8, 128>}]} {
    %c0_i32 = arith.constant 0 : i32
    %0 = arith.cmpi eq, %arg1, %c0_i32 : i32
    %1 = arith.extui %0 : i1 to i32
    %c0_i32_0 = arith.constant 0 : i32
    %2 = arith.cmpi ne, %1, %c0_i32_0 : i32
    scf.if %2 {
      %c0_66 = arith.constant 0 : index
      %c0_67 = arith.constant 0 : index
      %c0_68 = arith.constant 0 : index
      %168 = vector.load %arg2[%c0_66, %c0_67, %c0_68] : memref<2x8x32xf32, #tpu.memory_space<vmem>>, vector<2x8x32xf32>
      %c0_69 = arith.constant 0 : index
      %c0_70 = arith.constant 0 : index
      %169 = vector.load %arg6[%c0_69, %c0_70] : memref<8x32xf32, #tpu.memory_space<vmem>>, vector<8x32xf32>
      %170 = vector.shape_cast %169 : vector<8x32xf32> to vector<1x8x32xf32>
      %171 = vector.broadcast %170 : vector<1x8x32xf32> to vector<2x8x32xf32>
      %172 = arith.addf %168, %171 : vector<2x8x32xf32>
      %c0_71 = arith.constant 0 : index
      %c0_72 = arith.constant 0 : index
      %173 = vector.load %arg7[%c0_71, %c0_72] : memref<2x32xf32, #tpu.memory_space<vmem>>, vector<2x32xf32>
      %174 = vector.shape_cast %172 : vector<2x8x32xf32> to vector<16x32xf32>
      %175 = vector.extract_strided_slice %173 {offsets = [0, 0], sizes = [1, 32], strides = [1, 1]} : vector<2x32xf32> to vector<1x32xf32>
      %176 = vector.shape_cast %175 : vector<1x32xf32> to vector<32xf32>
      %177 = vector.extract_strided_slice %173 {offsets = [1, 0], sizes = [1, 32], strides = [1, 1]} : vector<2x32xf32> to vector<1x32xf32>
      %178 = vector.shape_cast %177 : vector<1x32xf32> to vector<32xf32>
      %cst_73 = arith.constant dense<0.000000e+00> : vector<16xf32>
      %179 = vector.multi_reduction <add>, %174, %cst_73 [1] : vector<16x32xf32> to vector<16xf32>
      %180 = vector.shape_cast %179 : vector<16xf32> to vector<16x1xf32>
      %cst_74 = arith.constant 3.200000e+01 : f32
      %181 = vector.broadcast %cst_74 : f32 to vector<16x1xf32>
      %182 = arith.divf %180, %181 : vector<16x1xf32>
      %183 = vector.broadcast %182 : vector<16x1xf32> to vector<16x32xf32>
      %184 = arith.subf %174, %183 : vector<16x32xf32>
      %185 = arith.mulf %184, %184 : vector<16x32xf32>
      %cst_75 = arith.constant dense<0.000000e+00> : vector<16xf32>
      %186 = vector.multi_reduction <add>, %185, %cst_75 [1] : vector<16x32xf32> to vector<16xf32>
      %187 = vector.shape_cast %186 : vector<16xf32> to vector<16x1xf32>
      %cst_76 = arith.constant 3.200000e+01 : f32
      %188 = vector.broadcast %cst_76 : f32 to vector<16x1xf32>
      %189 = arith.divf %187, %188 : vector<16x1xf32>
      %190 = vector.broadcast %182 : vector<16x1xf32> to vector<16x32xf32>
      %191 = arith.subf %174, %190 : vector<16x32xf32>
      %cst_77 = arith.constant 9.99999974E-6 : f32
      %192 = vector.broadcast %cst_77 : f32 to vector<16x1xf32>
      %193 = arith.addf %189, %192 : vector<16x1xf32>
      %194 = math.rsqrt %193 : vector<16x1xf32>
      %195 = vector.broadcast %194 : vector<16x1xf32> to vector<16x32xf32>
      %196 = arith.mulf %191, %195 : vector<16x32xf32>
      %197 = vector.shape_cast %176 : vector<32xf32> to vector<1x32xf32>
      %198 = vector.broadcast %197 : vector<1x32xf32> to vector<16x32xf32>
      %199 = arith.mulf %196, %198 : vector<16x32xf32>
      %200 = vector.shape_cast %178 : vector<32xf32> to vector<1x32xf32>
      %201 = vector.broadcast %200 : vector<1x32xf32> to vector<16x32xf32>
      %202 = arith.addf %199, %201 : vector<16x32xf32>
      %c0_78 = arith.constant 0 : index
      %c0_79 = arith.constant 0 : index
      %203 = vector.load %arg19[%c0_78, %c0_79] : memref<16x32xf32, #tpu.memory_space<vmem>>, vector<16x32xf32>
      tpu.vector_store %arg19[%c0_78, %c0_79], %202 {strides = array<i32>} : memref<16x32xf32, #tpu.memory_space<vmem>>, vector<16x32xf32>,
      %c0_80 = arith.constant 0 : index
      %c0_81 = arith.constant 0 : index
      %c0_82 = arith.constant 0 : index
      %204 = vector.load %arg5[%c0_80, %c0_81, %c0_82] : memref<2x1x8xf32, #tpu.memory_space<vmem>>, vector<2x1x8xf32>
      %205 = tpu.iota {dimensions = array<i32: 0>} : vector<8x8xi32>
      %206 = tpu.iota {dimensions = array<i32: 1>} : vector<8x8xi32>
      %207 = arith.cmpi sle, %206, %205 : vector<8x8xi32>
      %208 = vector.shape_cast %207 : vector<8x8xi1> to vector<1x8x8xi1>
      %cst_83 = arith.constant 0.000000e+00 : f32
      %209 = vector.broadcast %cst_83 : f32 to vector<2x1x8xf32>
      %210 = arith.cmpf one, %204, %209 : vector<2x1x8xf32>
      %211 = vector.broadcast %208 : vector<1x8x8xi1> to vector<2x8x8xi1>
      %212 = vector.broadcast %210 : vector<2x1x8xi1> to vector<2x8x8xi1>
      %213 = arith.andi %211, %212 : vector<2x8x8xi1>
      %cst_84 = arith.constant 0.000000e+00 : f32
      %cst_85 = arith.constant -1.000000e+09 : f32
      %214 = vector.broadcast %cst_84 : f32 to vector<2x8x8xf32>
      %215 = vector.broadcast %cst_85 : f32 to vector<2x8x8xf32>
      %216 = arith.select %213, %214, %215 : vector<2x8x8xi1>, vector<2x8x8xf32>
      %c0_86 = arith.constant 0 : index
      %c0_87 = arith.constant 0 : index
      %c0_88 = arith.constant 0 : index
      %217 = vector.load %arg20[%c0_86, %c0_87, %c0_88] : memref<2x8x8xf32, #tpu.memory_space<vmem>>, vector<2x8x8xf32>
      tpu.vector_store %arg20[%c0_86, %c0_87, %c0_88], %216 {strides = array<i32>} : memref<2x8x8xf32, #tpu.memory_space<vmem>>, vector<2x8x8xf32>,
    } else {
    }
    %c0 = arith.constant 0 : index
    %c0_1 = arith.constant 0 : index
    %3 = vector.load %arg19[%c0, %c0_1] : memref<16x32xf32, #tpu.memory_space<vmem>>, vector<16x32xf32>
    %c0_2 = arith.constant 0 : index
    %c0_3 = arith.constant 0 : index
    %c0_4 = arith.constant 0 : index
    %4 = vector.load %arg20[%c0_2, %c0_3, %c0_4] : memref<2x8x8xf32, #tpu.memory_space<vmem>>, vector<2x8x8xf32>
    %c0_5 = arith.constant 0 : index
    %c0_6 = arith.constant 0 : index
    %c0_7 = arith.constant 0 : index
    %5 = vector.load %arg8[%c0_5, %c0_6, %c0_7] : memref<1x2x32xf32, #tpu.memory_space<vmem>>, vector<1x2x32xf32>
    %6 = vector.shape_cast %5 : vector<1x2x32xf32> to vector<2x32xf32>
    %c0_8 = arith.constant 0 : index
    %c0_9 = arith.constant 0 : index
    %c0_10 = arith.constant 0 : index
    %7 = vector.load %arg13[%c0_8, %c0_9, %c0_10] : memref<1x2x32xf32, #tpu.memory_space<vmem>>, vector<1x2x32xf32>
    %8 = vector.shape_cast %7 : vector<1x2x32xf32> to vector<2x32xf32>
    %c0_11 = arith.constant 0 : index
    %c0_12 = arith.constant 0 : index
    %c0_13 = arith.constant 0 : index
    %9 = vector.load %arg9[%c0_11, %c0_12, %c0_13] : memref<1x32x96xbf16, #tpu.memory_space<vmem>>, vector<1x32x96xbf16>
    %10 = vector.shape_cast %9 : vector<1x32x96xbf16> to vector<32x96xbf16>
    %c0_14 = arith.constant 0 : index
    %c0_15 = arith.constant 0 : index
    %c0_16 = arith.constant 0 : index
    %11 = vector.load %arg10[%c0_14, %c0_15, %c0_16] : memref<1x1x96xf32, #tpu.memory_space<vmem>>, vector<1x1x96xf32>
    %12 = vector.shape_cast %11 : vector<1x1x96xf32> to vector<1x96xf32>
    %c0_17 = arith.constant 0 : index
    %c0_18 = arith.constant 0 : index
    %c0_19 = arith.constant 0 : index
    %13 = vector.load %arg11[%c0_17, %c0_18, %c0_19] : memref<1x32x32xbf16, #tpu.memory_space<vmem>>, vector<1x32x32xbf16>
    %14 = vector.shape_cast %13 : vector<1x32x32xbf16> to vector<32x32xbf16>
    %c0_20 = arith.constant 0 : index
    %c0_21 = arith.constant 0 : index
    %c0_22 = arith.constant 0 : index
    %15 = vector.load %arg12[%c0_20, %c0_21, %c0_22] : memref<1x1x32xf32, #tpu.memory_space<vmem>>, vector<1x1x32xf32>
    %16 = vector.shape_cast %15 : vector<1x1x32xf32> to vector<1x32xf32>
    %c0_23 = arith.constant 0 : index
    %c0_24 = arith.constant 0 : index
    %c0_25 = arith.constant 0 : index
    %17 = vector.load %arg14[%c0_23, %c0_24, %c0_25] : memref<1x32x128xbf16, #tpu.memory_space<vmem>>, vector<1x32x128xbf16>
    %18 = vector.shape_cast %17 : vector<1x32x128xbf16> to vector<32x128xbf16>
    %c0_26 = arith.constant 0 : index
    %c0_27 = arith.constant 0 : index
    %c0_28 = arith.constant 0 : index
    %19 = vector.load %arg15[%c0_26, %c0_27, %c0_28] : memref<1x1x128xf32, #tpu.memory_space<vmem>>, vector<1x1x128xf32>
    %20 = vector.shape_cast %19 : vector<1x1x128xf32> to vector<1x128xf32>
    %c0_29 = arith.constant 0 : index
    %c0_30 = arith.constant 0 : index
    %c0_31 = arith.constant 0 : index
    %21 = vector.load %arg16[%c0_29, %c0_30, %c0_31] : memref<1x128x32xbf16, #tpu.memory_space<vmem>>, vector<1x128x32xbf16>
    %22 = vector.shape_cast %21 : vector<1x128x32xbf16> to vector<128x32xbf16>
    %c0_32 = arith.constant 0 : index
    %c0_33 = arith.constant 0 : index
    %c0_34 = arith.constant 0 : index
    %23 = vector.load %arg17[%c0_32, %c0_33, %c0_34] : memref<1x1x32xf32, #tpu.memory_space<vmem>>, vector<1x1x32xf32>
    %24 = vector.shape_cast %23 : vector<1x1x32xf32> to vector<1x32xf32>
    %25 = vector.extract_strided_slice %6 {offsets = [0, 0], sizes = [1, 32], strides = [1, 1]} : vector<2x32xf32> to vector<1x32xf32>
    %26 = vector.shape_cast %25 : vector<1x32xf32> to vector<32xf32>
    %27 = vector.extract_strided_slice %6 {offsets = [1, 0], sizes = [1, 32], strides = [1, 1]} : vector<2x32xf32> to vector<1x32xf32>
    %28 = vector.shape_cast %27 : vector<1x32xf32> to vector<32xf32>
    %cst = arith.constant dense<0.000000e+00> : vector<16xf32>
    %29 = vector.multi_reduction <add>, %3, %cst [1] : vector<16x32xf32> to vector<16xf32>
    %30 = vector.shape_cast %29 : vector<16xf32> to vector<16x1xf32>
    %cst_35 = arith.constant 3.200000e+01 : f32
    %31 = vector.broadcast %cst_35 : f32 to vector<16x1xf32>
    %32 = arith.divf %30, %31 : vector<16x1xf32>
    %33 = vector.broadcast %32 : vector<16x1xf32> to vector<16x32xf32>
    %34 = arith.subf %3, %33 : vector<16x32xf32>
    %35 = arith.mulf %34, %34 : vector<16x32xf32>
    %cst_36 = arith.constant dense<0.000000e+00> : vector<16xf32>
    %36 = vector.multi_reduction <add>, %35, %cst_36 [1] : vector<16x32xf32> to vector<16xf32>
    %37 = vector.shape_cast %36 : vector<16xf32> to vector<16x1xf32>
    %cst_37 = arith.constant 3.200000e+01 : f32
    %38 = vector.broadcast %cst_37 : f32 to vector<16x1xf32>
    %39 = arith.divf %37, %38 : vector<16x1xf32>
    %40 = vector.broadcast %32 : vector<16x1xf32> to vector<16x32xf32>
    %41 = arith.subf %3, %40 : vector<16x32xf32>
    %cst_38 = arith.constant 9.99999974E-6 : f32
    %42 = vector.broadcast %cst_38 : f32 to vector<16x1xf32>
    %43 = arith.addf %39, %42 : vector<16x1xf32>
    %44 = math.rsqrt %43 : vector<16x1xf32>
    %45 = vector.broadcast %44 : vector<16x1xf32> to vector<16x32xf32>
    %46 = arith.mulf %41, %45 : vector<16x32xf32>
    %47 = vector.shape_cast %26 : vector<32xf32> to vector<1x32xf32>
    %48 = vector.broadcast %47 : vector<1x32xf32> to vector<16x32xf32>
    %49 = arith.mulf %46, %48 : vector<16x32xf32>
    %50 = vector.shape_cast %28 : vector<32xf32> to vector<1x32xf32>
    %51 = vector.broadcast %50 : vector<1x32xf32> to vector<16x32xf32>
    %52 = arith.addf %49, %51 : vector<16x32xf32>
    %53 = arith.truncf %52 : vector<16x32xf32> to vector<16x32xbf16>
    %cst_39 = arith.constant dense<0.000000e+00> : vector<16x96xf32>
    %54 = tpu.matmul %53, %10, %cst_39 {dimension_numbers = #tpu.dot_dimension_numbers<[1], [0], [0], [1], [0, 0, 1, 1], [], []>} : vector<16x32xbf16>, vector<32x96xbf16>, vector<16x96xf32> -> vector<16x96xf32>
    %55 = vector.broadcast %12 : vector<1x96xf32> to vector<16x96xf32>
    %56 = arith.addf %54, %55 : vector<16x96xf32>
    %57 = arith.truncf %56 : vector<16x96xf32> to vector<16x96xbf16>
    %58 = vector.extract_strided_slice %57 {offsets = [0, 0], sizes = [16, 16], strides = [1, 1]} : vector<16x96xbf16> to vector<16x16xbf16>
    %59 = vector.shape_cast %58 : vector<16x16xbf16> to vector<2x8x16xbf16>
    %60 = vector.extract_strided_slice %57 {offsets = [0, 32], sizes = [16, 16], strides = [1, 1]} : vector<16x96xbf16> to vector<16x16xbf16>
    %61 = vector.shape_cast %60 : vector<16x16xbf16> to vector<2x8x16xbf16>
    %62 = vector.extract_strided_slice %57 {offsets = [0, 64], sizes = [16, 16], strides = [1, 1]} : vector<16x96xbf16> to vector<16x16xbf16>
    %63 = vector.shape_cast %62 : vector<16x16xbf16> to vector<2x8x16xbf16>
    "tpu.trace_start"() <{level = 10 : i32, message = "bqd,bkd->bqk"}> : () -> ()
    %cst_40 = arith.constant dense<0.000000e+00> : vector<2x8x8xf32>
    %64 = tpu.matmul %59, %61, %cst_40 {dimension_numbers = #tpu.dot_dimension_numbers<[2], [2], [1], [1], [0, 0, 0, 1, 1, 1], [0], [0]>} : vector<2x8x16xbf16>, vector<2x8x16xbf16>, vector<2x8x8xf32> -> vector<2x8x8xf32>
    "tpu.trace_stop"() : () -> ()
    %cst_41 = arith.constant 2.500000e-01 : f32
    %65 = vector.broadcast %cst_41 : f32 to vector<2x8x8xf32>
    %66 = arith.mulf %64, %65 : vector<2x8x8xf32>
    %67 = arith.addf %66, %4 : vector<2x8x8xf32>
    %cst_42 = arith.constant dense<0xFF800000> : vector<2x8xf32>
    %68 = vector.multi_reduction <maximumf>, %67, %cst_42 [2] : vector<2x8x8xf32> to vector<2x8xf32>
    %69 = vector.shape_cast %68 : vector<2x8xf32> to vector<2x8x1xf32>
    %70 = vector.broadcast %69 : vector<2x8x1xf32> to vector<2x8x8xf32>
    %71 = arith.subf %67, %70 : vector<2x8x8xf32>
    %72 = math.exp %71 : vector<2x8x8xf32>
    %cst_43 = arith.constant dense<0.000000e+00> : vector<2x8xf32>
    %73 = vector.multi_reduction <add>, %72, %cst_43 [2] : vector<2x8x8xf32> to vector<2x8xf32>
    %74 = vector.shape_cast %73 : vector<2x8xf32> to vector<2x8x1xf32>
    %75 = tpu.reciprocal %74 {approx = true} : vector<2x8x1xf32> -> vector<2x8x1xf32>
    %76 = vector.broadcast %75 : vector<2x8x1xf32> to vector<2x8x8xf32>
    %77 = arith.mulf %72, %76 : vector<2x8x8xf32>
    %78 = arith.truncf %77 : vector<2x8x8xf32> to vector<2x8x8xbf16>
    "tpu.trace_start"() <{level = 10 : i32, message = "bqk,bkd->bqd"}> : () -> ()
    %cst_44 = arith.constant dense<0.000000e+00> : vector<2x8x16xf32>
    %79 = tpu.matmul %78, %63, %cst_44 {dimension_numbers = #tpu.dot_dimension_numbers<[2], [1], [1], [2], [0, 0, 0, 1, 1, 2], [0], [0]>} : vector<2x8x8xbf16>, vector<2x8x16xbf16>, vector<2x8x16xf32> -> vector<2x8x16xf32>
    "tpu.trace_stop"() : () -> ()
    %80 = vector.shape_cast %79 : vector<2x8x16xf32> to vector<16x16xf32>
    %81 = arith.truncf %80 : vector<16x16xf32> to vector<16x16xbf16>
    %82 = vector.extract_strided_slice %14 {offsets = [0, 0], sizes = [16, 32], strides = [1, 1]} : vector<32x32xbf16> to vector<16x32xbf16>
    %cst_45 = arith.constant dense<0.000000e+00> : vector<16x32xf32>
    %83 = tpu.matmul %81, %82, %cst_45 {dimension_numbers = #tpu.dot_dimension_numbers<[1], [0], [0], [1], [0, 0, 1, 1], [], []>} : vector<16x16xbf16>, vector<16x32xbf16>, vector<16x32xf32> -> vector<16x32xf32>
    %84 = vector.extract_strided_slice %57 {offsets = [0, 16], sizes = [16, 16], strides = [1, 1]} : vector<16x96xbf16> to vector<16x16xbf16>
    %85 = vector.shape_cast %84 : vector<16x16xbf16> to vector<2x8x16xbf16>
    %86 = vector.extract_strided_slice %57 {offsets = [0, 48], sizes = [16, 16], strides = [1, 1]} : vector<16x96xbf16> to vector<16x16xbf16>
    %87 = vector.shape_cast %86 : vector<16x16xbf16> to vector<2x8x16xbf16>
    %88 = vector.extract_strided_slice %57 {offsets = [0, 80], sizes = [16, 16], strides = [1, 1]} : vector<16x96xbf16> to vector<16x16xbf16>
    %89 = vector.shape_cast %88 : vector<16x16xbf16> to vector<2x8x16xbf16>
    "tpu.trace_start"() <{level = 10 : i32, message = "bqd,bkd->bqk"}> : () -> ()
    %cst_46 = arith.constant dense<0.000000e+00> : vector<2x8x8xf32>
    %90 = tpu.matmul %85, %87, %cst_46 {dimension_numbers = #tpu.dot_dimension_numbers<[2], [2], [1], [1], [0, 0, 0, 1, 1, 1], [0], [0]>} : vector<2x8x16xbf16>, vector<2x8x16xbf16>, vector<2x8x8xf32> -> vector<2x8x8xf32>
    "tpu.trace_stop"() : () -> ()
    %cst_47 = arith.constant 2.500000e-01 : f32
    %91 = vector.broadcast %cst_47 : f32 to vector<2x8x8xf32>
    %92 = arith.mulf %90, %91 : vector<2x8x8xf32>
    %93 = arith.addf %92, %4 : vector<2x8x8xf32>
    %cst_48 = arith.constant dense<0xFF800000> : vector<2x8xf32>
    %94 = vector.multi_reduction <maximumf>, %93, %cst_48 [2] : vector<2x8x8xf32> to vector<2x8xf32>
    %95 = vector.shape_cast %94 : vector<2x8xf32> to vector<2x8x1xf32>
    %96 = vector.broadcast %95 : vector<2x8x1xf32> to vector<2x8x8xf32>
    %97 = arith.subf %93, %96 : vector<2x8x8xf32>
    %98 = math.exp %97 : vector<2x8x8xf32>
    %cst_49 = arith.constant dense<0.000000e+00> : vector<2x8xf32>
    %99 = vector.multi_reduction <add>, %98, %cst_49 [2] : vector<2x8x8xf32> to vector<2x8xf32>
    %100 = vector.shape_cast %99 : vector<2x8xf32> to vector<2x8x1xf32>
    %101 = tpu.reciprocal %100 {approx = true} : vector<2x8x1xf32> -> vector<2x8x1xf32>
    %102 = vector.broadcast %101 : vector<2x8x1xf32> to vector<2x8x8xf32>
    %103 = arith.mulf %98, %102 : vector<2x8x8xf32>
    %104 = arith.truncf %103 : vector<2x8x8xf32> to vector<2x8x8xbf16>
    "tpu.trace_start"() <{level = 10 : i32, message = "bqk,bkd->bqd"}> : () -> ()
    %cst_50 = arith.constant dense<0.000000e+00> : vector<2x8x16xf32>
    %105 = tpu.matmul %104, %89, %cst_50 {dimension_numbers = #tpu.dot_dimension_numbers<[2], [1], [1], [2], [0, 0, 0, 1, 1, 2], [0], [0]>} : vector<2x8x8xbf16>, vector<2x8x16xbf16>, vector<2x8x16xf32> -> vector<2x8x16xf32>
    "tpu.trace_stop"() : () -> ()
    %106 = vector.shape_cast %105 : vector<2x8x16xf32> to vector<16x16xf32>
    %107 = arith.truncf %106 : vector<16x16xf32> to vector<16x16xbf16>
    %108 = vector.extract_strided_slice %14 {offsets = [16, 0], sizes = [16, 32], strides = [1, 1]} : vector<32x32xbf16> to vector<16x32xbf16>
    %cst_51 = arith.constant dense<0.000000e+00> : vector<16x32xf32>
    %109 = tpu.matmul %107, %108, %cst_51 {dimension_numbers = #tpu.dot_dimension_numbers<[1], [0], [0], [1], [0, 0, 1, 1], [], []>} : vector<16x16xbf16>, vector<16x32xbf16>, vector<16x32xf32> -> vector<16x32xf32>
    %110 = arith.addf %83, %109 : vector<16x32xf32>
    %111 = arith.addf %3, %110 : vector<16x32xf32>
    %112 = vector.broadcast %16 : vector<1x32xf32> to vector<16x32xf32>
    %113 = arith.addf %111, %112 : vector<16x32xf32>
    %114 = vector.extract_strided_slice %8 {offsets = [0, 0], sizes = [1, 32], strides = [1, 1]} : vector<2x32xf32> to vector<1x32xf32>
    %115 = vector.shape_cast %114 : vector<1x32xf32> to vector<32xf32>
    %116 = vector.extract_strided_slice %8 {offsets = [1, 0], sizes = [1, 32], strides = [1, 1]} : vector<2x32xf32> to vector<1x32xf32>
    %117 = vector.shape_cast %116 : vector<1x32xf32> to vector<32xf32>
    %cst_52 = arith.constant dense<0.000000e+00> : vector<16xf32>
    %118 = vector.multi_reduction <add>, %113, %cst_52 [1] : vector<16x32xf32> to vector<16xf32>
    %119 = vector.shape_cast %118 : vector<16xf32> to vector<16x1xf32>
    %cst_53 = arith.constant 3.200000e+01 : f32
    %120 = vector.broadcast %cst_53 : f32 to vector<16x1xf32>
    %121 = arith.divf %119, %120 : vector<16x1xf32>
    %122 = vector.broadcast %121 : vector<16x1xf32> to vector<16x32xf32>
    %123 = arith.subf %113, %122 : vector<16x32xf32>
    %124 = arith.mulf %123, %123 : vector<16x32xf32>
    %cst_54 = arith.constant dense<0.000000e+00> : vector<16xf32>
    %125 = vector.multi_reduction <add>, %124, %cst_54 [1] : vector<16x32xf32> to vector<16xf32>
    %126 = vector.shape_cast %125 : vector<16xf32> to vector<16x1xf32>
    %cst_55 = arith.constant 3.200000e+01 : f32
    %127 = vector.broadcast %cst_55 : f32 to vector<16x1xf32>
    %128 = arith.divf %126, %127 : vector<16x1xf32>
    %129 = vector.broadcast %121 : vector<16x1xf32> to vector<16x32xf32>
    %130 = arith.subf %113, %129 : vector<16x32xf32>
    %cst_56 = arith.constant 9.99999974E-6 : f32
    %131 = vector.broadcast %cst_56 : f32 to vector<16x1xf32>
    %132 = arith.addf %128, %131 : vector<16x1xf32>
    %133 = math.rsqrt %132 : vector<16x1xf32>
    %134 = vector.broadcast %133 : vector<16x1xf32> to vector<16x32xf32>
    %135 = arith.mulf %130, %134 : vector<16x32xf32>
    %136 = vector.shape_cast %115 : vector<32xf32> to vector<1x32xf32>
    %137 = vector.broadcast %136 : vector<1x32xf32> to vector<16x32xf32>
    %138 = arith.mulf %135, %137 : vector<16x32xf32>
    %139 = vector.shape_cast %117 : vector<32xf32> to vector<1x32xf32>
    %140 = vector.broadcast %139 : vector<1x32xf32> to vector<16x32xf32>
    %141 = arith.addf %138, %140 : vector<16x32xf32>
    %142 = arith.truncf %141 : vector<16x32xf32> to vector<16x32xbf16>
    %cst_57 = arith.constant dense<0.000000e+00> : vector<16x128xf32>
    %143 = tpu.matmul %142, %18, %cst_57 {dimension_numbers = #tpu.dot_dimension_numbers<[1], [0], [0], [1], [0, 0, 1, 1], [], []>} : vector<16x32xbf16>, vector<32x128xbf16>, vector<16x128xf32> -> vector<16x128xf32>
    %144 = vector.broadcast %20 : vector<1x128xf32> to vector<16x128xf32>
    %145 = arith.addf %143, %144 : vector<16x128xf32>
    %cst_58 = arith.constant 5.000000e-01 : f32
    %146 = vector.broadcast %cst_58 : f32 to vector<16x128xf32>
    %147 = arith.mulf %146, %145 : vector<16x128xf32>
    %cst_59 = arith.constant 4.471500e-02 : f32
    %148 = vector.broadcast %cst_59 : f32 to vector<16x128xf32>
    %149 = arith.mulf %148, %145 : vector<16x128xf32>
    %150 = arith.mulf %149, %145 : vector<16x128xf32>
    %151 = arith.mulf %150, %145 : vector<16x128xf32>
    %152 = arith.addf %145, %151 : vector<16x128xf32>
    %cst_60 = arith.constant 0.797884583 : f32
    %153 = vector.broadcast %cst_60 : f32 to vector<16x128xf32>
    %154 = arith.mulf %153, %152 : vector<16x128xf32>
    %155 = math.tanh %154 : vector<16x128xf32>
    %cst_61 = arith.constant 1.000000e+00 : f32
    %156 = vector.broadcast %cst_61 : f32 to vector<16x128xf32>
    %157 = arith.addf %156, %155 : vector<16x128xf32>
    %158 = arith.mulf %147, %157 : vector<16x128xf32>
    %159 = arith.truncf %158 : vector<16x128xf32> to vector<16x128xbf16>
    %cst_62 = arith.constant dense<0.000000e+00> : vector<16x32xf32>
    %160 = tpu.matmul %159, %22, %cst_62 {dimension_numbers = #tpu.dot_dimension_numbers<[1], [0], [0], [1], [0, 0, 1, 1], [], []>} : vector<16x128xbf16>, vector<128x32xbf16>, vector<16x32xf32> -> vector<16x32xf32>
    %161 = vector.broadcast %24 : vector<1x32xf32> to vector<16x32xf32>
    %162 = arith.addf %160, %161 : vector<16x32xf32>
    %163 = arith.addf %113, %162 : vector<16x32xf32>
    %c0_63 = arith.constant 0 : index
    %c0_64 = arith.constant 0 : index
    %164 = vector.load %arg19[%c0_63, %c0_64] : memref<16x32xf32, #tpu.memory_space<vmem>>, vector<16x32xf32>
    tpu.vector_store %arg19[%c0_63, %c0_64], %163 {strides = array<i32>} : memref<16x32xf32, #tpu.memory_space<vmem>>, vector<16x32xf32>,
    %c1_i32 = arith.constant 1 : i32
    %165 = arith.cmpi eq, %arg1, %c1_i32 : i32
    %166 = arith.extui %165 : i1 to i32
    %c0_i32_65 = arith.constant 0 : i32
    %167 = arith.cmpi ne, %166, %c0_i32_65 : i32
    scf.if %167 {
      %168 = vector.shape_cast %163 : vector<16x32xf32> to vector<2x8x32xf32>
      %c0_66 = arith.constant 0 : index
      %c0_67 = arith.constant 0 : index
      %c0_68 = arith.constant 0 : index
      %169 = vector.load %arg3[%c0_66, %c0_67, %c0_68] : memref<2x8x32xf32, #tpu.memory_space<vmem>>, vector<2x8x32xf32>
      %170 = arith.mulf %168, %169 : vector<2x8x32xf32>
      %cst_69 = arith.constant dense<0.000000e+00> : vector<2x8xf32>
      %171 = vector.multi_reduction <add>, %170, %cst_69 [2] : vector<2x8x32xf32> to vector<2x8xf32>
      %c0_70 = arith.constant 0 : index
      %c0_71 = arith.constant 0 : index
      %c0_72 = arith.constant 0 : index
      %172 = vector.load %arg4[%c0_70, %c0_71, %c0_72] : memref<2x8x32xf32, #tpu.memory_space<vmem>>, vector<2x8x32xf32>
      %173 = arith.mulf %168, %172 : vector<2x8x32xf32>
      %cst_73 = arith.constant dense<0.000000e+00> : vector<2x8xf32>
      %174 = vector.multi_reduction <add>, %173, %cst_73 [2] : vector<2x8x32xf32> to vector<2x8xf32>
      %c0_74 = arith.constant 0 : index
      %c0_75 = arith.constant 0 : index
      %c0_76 = arith.constant 0 : index
      %175 = vector.load %arg5[%c0_74, %c0_75, %c0_76] : memref<2x1x8xf32, #tpu.memory_space<vmem>>, vector<2x1x8xf32>
      %176 = vector.shape_cast %175 : vector<2x1x8xf32> to vector<2x8xf32>
      %cst_77 = arith.constant 0.000000e+00 : f32
      %177 = vector.broadcast %cst_77 : f32 to vector<2x8xf32>
      %178 = arith.cmpf one, %176, %177 : vector<2x8xf32>
      %179 = arith.extui %178 : vector<2x8xi1> to vector<2x8xi32>
      %180 = arith.sitofp %179 : vector<2x8xi32> to vector<2x8xf32>
      %cst_78 = arith.constant 0.000000e+00 : f32
      %181 = vector.broadcast %cst_78 : f32 to vector<2x8xf32>
      %182 = arith.maximumf %171, %181 : vector<2x8xf32>
      %cst_79 = arith.constant 1.000000e+00 : f32
      %183 = vector.broadcast %cst_79 : f32 to vector<2x8xf32>
      %184 = arith.mulf %171, %183 : vector<2x8xf32>
      %185 = arith.subf %182, %184 : vector<2x8xf32>
      %186 = math.absf %171 : vector<2x8xf32>
      %cst_80 = arith.constant 0.000000e+00 : f32
      %187 = vector.broadcast %cst_80 : f32 to vector<2x8xf32>
      %188 = arith.subf %187, %186 : vector<2x8xf32>
      %189 = math.exp %188 : vector<2x8xf32>
      %190 = math.log1p %189 : vector<2x8xf32>
      %191 = arith.addf %185, %190 : vector<2x8xf32>
      %192 = arith.mulf %180, %191 : vector<2x8xf32>
      %193 = vector.shape_cast %192 : vector<2x8xf32> to vector<1x2x8xf32>
      %cst_81 = arith.constant dense<0.000000e+00> : vector<1xf32>
      %194 = vector.multi_reduction <add>, %193, %cst_81 [1, 2] : vector<1x2x8xf32> to vector<1xf32>
      %195 = vector.shape_cast %194 : vector<1xf32> to vector<1x1x1xf32>
      %196 = vector.extract %195[0, 0, 0] : f32 from vector<1x1x1xf32>
      %cst_82 = arith.constant 0.000000e+00 : f32
      %197 = vector.broadcast %cst_82 : f32 to vector<2x8xf32>
      %198 = arith.maximumf %174, %197 : vector<2x8xf32>
      %cst_83 = arith.constant 0.000000e+00 : f32
      %199 = vector.broadcast %cst_83 : f32 to vector<2x8xf32>
      %200 = arith.mulf %174, %199 : vector<2x8xf32>
      %201 = arith.subf %198, %200 : vector<2x8xf32>
      %202 = math.absf %174 : vector<2x8xf32>
      %cst_84 = arith.constant 0.000000e+00 : f32
      %203 = vector.broadcast %cst_84 : f32 to vector<2x8xf32>
      %204 = arith.subf %203, %202 : vector<2x8xf32>
      %205 = math.exp %204 : vector<2x8xf32>
      %206 = math.log1p %205 : vector<2x8xf32>
      %207 = arith.addf %201, %206 : vector<2x8xf32>
      %208 = arith.mulf %180, %207 : vector<2x8xf32>
      %209 = vector.shape_cast %208 : vector<2x8xf32> to vector<1x2x8xf32>
      %cst_85 = arith.constant dense<0.000000e+00> : vector<1xf32>
      %210 = vector.multi_reduction <add>, %209, %cst_85 [1, 2] : vector<1x2x8xf32> to vector<1xf32>
      %211 = vector.shape_cast %210 : vector<1xf32> to vector<1x1x1xf32>
      %212 = vector.extract %211[0, 0, 0] : f32 from vector<1x1x1xf32>
      %213 = vector.shape_cast %180 : vector<2x8xf32> to vector<1x2x8xf32>
      %cst_86 = arith.constant dense<0.000000e+00> : vector<1xf32>
      %214 = vector.multi_reduction <add>, %213, %cst_86 [1, 2] : vector<1x2x8xf32> to vector<1xf32>
      %215 = vector.shape_cast %214 : vector<1xf32> to vector<1x1x1xf32>
      %216 = vector.extract %215[0, 0, 0] : f32 from vector<1x1x1xf32>
      %217 = tpu.iota {dimensions = array<i32: 0>} : vector<8x128xi32>
      %c0_i32_87 = arith.constant 0 : i32
      %218 = vector.broadcast %c0_i32_87 : i32 to vector<8x128xi32>
      %219 = arith.cmpi eq, %217, %218 : vector<8x128xi32>
      %cst_88 = arith.constant 0.000000e+00 : f32
      %220 = vector.broadcast %196 : f32 to vector<8x128xf32>
      %221 = vector.broadcast %cst_88 : f32 to vector<8x128xf32>
      %222 = arith.select %219, %220, %221 : vector<8x128xi1>, vector<8x128xf32>
      %c1_i32_89 = arith.constant 1 : i32
      %223 = vector.broadcast %c1_i32_89 : i32 to vector<8x128xi32>
      %224 = arith.cmpi eq, %217, %223 : vector<8x128xi32>
      %cst_90 = arith.constant 0.000000e+00 : f32
      %225 = vector.broadcast %212 : f32 to vector<8x128xf32>
      %226 = vector.broadcast %cst_90 : f32 to vector<8x128xf32>
      %227 = arith.select %224, %225, %226 : vector<8x128xi1>, vector<8x128xf32>
      %228 = arith.addf %222, %227 : vector<8x128xf32>
      %c2_i32 = arith.constant 2 : i32
      %229 = vector.broadcast %c2_i32 : i32 to vector<8x128xi32>
      %230 = arith.cmpi eq, %217, %229 : vector<8x128xi32>
      %cst_91 = arith.constant 0.000000e+00 : f32
      %231 = vector.broadcast %216 : f32 to vector<8x128xf32>
      %232 = vector.broadcast %cst_91 : f32 to vector<8x128xf32>
      %233 = arith.select %230, %231, %232 : vector<8x128xi1>, vector<8x128xf32>
      %234 = arith.addf %228, %233 : vector<8x128xf32>
      %235 = vector.shape_cast %234 : vector<8x128xf32> to vector<1x8x128xf32>
      %c0_92 = arith.constant 0 : index
      %c0_93 = arith.constant 0 : index
      %c0_94 = arith.constant 0 : index
      %236 = vector.load %arg18[%c0_92, %c0_93, %c0_94] : memref<1x8x128xf32, #tpu.memory_space<vmem>>, vector<1x8x128xf32>
      tpu.vector_store %arg18[%c0_92, %c0_93, %c0_94], %235 {strides = array<i32>} : memref<1x8x128xf32, #tpu.memory_space<vmem>>, vector<1x8x128xf32>,
    } else {
    }
    return
  }
  func.func @transform_0(%arg0: i32, %arg1: i32) -> (i32, i32, i32) {
    %c0_i32 = arith.constant 0 : i32
    %c0_i32_0 = arith.constant 0 : i32
    %c0_i32_1 = arith.constant 0 : i32
    return %arg0, %c0_i32, %c0_i32_0 : i32, i32, i32
  }
  func.func @transform_1(%arg0: i32, %arg1: i32) -> (i32, i32, i32) {
    %c0_i32 = arith.constant 0 : i32
    %c0_i32_0 = arith.constant 0 : i32
    %c0_i32_1 = arith.constant 0 : i32
    return %arg0, %c0_i32, %c0_i32_0 : i32, i32, i32
  }
  func.func @transform_2(%arg0: i32, %arg1: i32) -> (i32, i32, i32) {
    %c0_i32 = arith.constant 0 : i32
    %c0_i32_0 = arith.constant 0 : i32
    %c0_i32_1 = arith.constant 0 : i32
    return %arg0, %c0_i32, %c0_i32_0 : i32, i32, i32
  }
  func.func @transform_3(%arg0: i32, %arg1: i32) -> (i32, i32, i32) {
    %c0_i32 = arith.constant 0 : i32
    %c0_i32_0 = arith.constant 0 : i32
    %c0_i32_1 = arith.constant 0 : i32
    return %arg0, %c0_i32, %c0_i32_0 : i32, i32, i32
  }
  func.func @transform_4(%arg0: i32, %arg1: i32) -> (i32, i32) {
    %c0_i32 = arith.constant 0 : i32
    %c0_i32_0 = arith.constant 0 : i32
    %c0_i32_1 = arith.constant 0 : i32
    return %c0_i32, %c0_i32_0 : i32, i32
  }
  func.func @transform_5(%arg0: i32, %arg1: i32) -> (i32, i32) {
    %c0_i32 = arith.constant 0 : i32
    %c0_i32_0 = arith.constant 0 : i32
    %c0_i32_1 = arith.constant 0 : i32
    return %c0_i32, %c0_i32_0 : i32, i32
  }
  func.func @transform_6(%arg0: i32, %arg1: i32) -> (i32, i32, i32) {
    %c0_i32 = arith.constant 0 : i32
    %c0_i32_0 = arith.constant 0 : i32
    %c0_i32_1 = arith.constant 0 : i32
    return %arg1, %c0_i32, %c0_i32_0 : i32, i32, i32
  }
  func.func @transform_7(%arg0: i32, %arg1: i32) -> (i32, i32, i32) {
    %c0_i32 = arith.constant 0 : i32
    %c0_i32_0 = arith.constant 0 : i32
    %c0_i32_1 = arith.constant 0 : i32
    return %arg1, %c0_i32, %c0_i32_0 : i32, i32, i32
  }
  func.func @transform_8(%arg0: i32, %arg1: i32) -> (i32, i32, i32) {
    %c0_i32 = arith.constant 0 : i32
    %c0_i32_0 = arith.constant 0 : i32
    %c0_i32_1 = arith.constant 0 : i32
    return %arg1, %c0_i32, %c0_i32_0 : i32, i32, i32
  }
  func.func @transform_9(%arg0: i32, %arg1: i32) -> (i32, i32, i32) {
    %c0_i32 = arith.constant 0 : i32
    %c0_i32_0 = arith.constant 0 : i32
    %c0_i32_1 = arith.constant 0 : i32
    return %arg1, %c0_i32, %c0_i32_0 : i32, i32, i32
  }
  func.func @transform_10(%arg0: i32, %arg1: i32) -> (i32, i32, i32) {
    %c0_i32 = arith.constant 0 : i32
    %c0_i32_0 = arith.constant 0 : i32
    %c0_i32_1 = arith.constant 0 : i32
    return %arg1, %c0_i32, %c0_i32_0 : i32, i32, i32
  }
  func.func @transform_11(%arg0: i32, %arg1: i32) -> (i32, i32, i32) {
    %c0_i32 = arith.constant 0 : i32
    %c0_i32_0 = arith.constant 0 : i32
    %c0_i32_1 = arith.constant 0 : i32
    return %arg1, %c0_i32, %c0_i32_0 : i32, i32, i32
  }
  func.func @transform_12(%arg0: i32, %arg1: i32) -> (i32, i32, i32) {
    %c0_i32 = arith.constant 0 : i32
    %c0_i32_0 = arith.constant 0 : i32
    %c0_i32_1 = arith.constant 0 : i32
    return %arg1, %c0_i32, %c0_i32_0 : i32, i32, i32
  }
  func.func @transform_13(%arg0: i32, %arg1: i32) -> (i32, i32, i32) {
    %c0_i32 = arith.constant 0 : i32
    %c0_i32_0 = arith.constant 0 : i32
    %c0_i32_1 = arith.constant 0 : i32
    return %arg1, %c0_i32, %c0_i32_0 : i32, i32, i32
  }
  func.func @transform_14(%arg0: i32, %arg1: i32) -> (i32, i32, i32) {
    %c0_i32 = arith.constant 0 : i32
    %c0_i32_0 = arith.constant 0 : i32
    %c0_i32_1 = arith.constant 0 : i32
    return %arg1, %c0_i32, %c0_i32_0 : i32, i32, i32
  }
  func.func @transform_15(%arg0: i32, %arg1: i32) -> (i32, i32, i32) {
    %c0_i32 = arith.constant 0 : i32
    %c0_i32_0 = arith.constant 0 : i32
    %c0_i32_1 = arith.constant 0 : i32
    return %arg1, %c0_i32, %c0_i32_0 : i32, i32, i32
  }
  func.func @transform_16(%arg0: i32, %arg1: i32) -> (i32, i32, i32) {
    %c0_i32 = arith.constant 0 : i32
    %c0_i32_0 = arith.constant 0 : i32
    %c0_i32_1 = arith.constant 0 : i32
    return %arg0, %c0_i32, %c0_i32_0 : i32, i32, i32
  }
}

</mosaic_0001>

<bundles_post_ra>
// kernel: model_forward.1
= control target key start
LH: loop header
LB: loop body
LE: loop exit
PB: predicated region body
PF: predicated region fallthrough
CT: control target
= control target key end

     0   :  { %s3027_s21 = smov 0   ;;  %s3029_s22 = smov 0   ;;  %s3482_s0 = inlined_call_operand.vmem [shape: f32[2,8,32], index: 0, kind: input, shape index: {}]   ;;  %s3483_s1 = inlined_call_operand.vmem [shape: f32[2,8,32], index: 1, kind: input, shape index: {}]   ;;  %s3484_s2 = inlined_call_operand.vmem [shape: f32[2,8,32], index: 2, kind: input, shape index: {}]   ;;  %s3485_s3 = inlined_call_operand.vmem [shape: f32[2,1,8], index: 3, kind: input, shape index: {}]   ;;  %s3486_s4 = inlined_call_operand.vmem [shape: f32[8,32], index: 4, kind: input, shape index: {}]   ;;  %s3487_s5 = inlined_call_operand.vmem [shape: f32[2,32], index: 5, kind: input, shape index: {}]   ;;  %s3488_s6 = inlined_call_operand.vmem [shape: f32[2,2,32], index: 6, kind: input, shape index: {}]   ;;  %s3489_s7 = inlined_call_operand.vmem [shape: bf16[2,32,96], index: 7, kind: input, shape index: {}]   ;;  %s3490_s8 = inlined_call_operand.vmem [shape: f32[2,1,96], index: 8, kind: input, shape index: {}]   ;;  %s3491_s9 = inlined_call_operand.vmem [shape: bf16[2,32,32], index: 9, kind: input, shape index: {}]   ;;  %s3492_s10 = inlined_call_operand.vmem [shape: f32[2,1,32], index: 10, kind: input, shape index: {}]   ;;  %s3493_s11 = inlined_call_operand.vmem [shape: f32[2,2,32], index: 11, kind: input, shape index: {}]   ;;  %s3494_s12 = inlined_call_operand.vmem [shape: bf16[2,32,128], index: 12, kind: input, shape index: {}]   ;;  %s3495_s13 = inlined_call_operand.vmem [shape: f32[2,1,128], index: 13, kind: input, shape index: {}]   ;;  %s3496_s14 = inlined_call_operand.vmem [shape: bf16[2,128,32], index: 14, kind: input, shape index: {}]   ;;  %s3497_s15 = inlined_call_operand.vmem [shape: f32[2,1,32], index: 15, kind: input, shape index: {}]   ;;  %s3498_s16 = inlined_call_operand.vmem [shape: f32[1,8,128], index: 16, kind: output, shape index: {}]  }
   0x1   :  { %3504 = sst [smem:[#allocation8_spill]] %s3482_s0  ;;  %s3031_s23 = smov 0  }
   0x2   :  { %3505 = sst [smem:[#allocation9_spill]] %s3483_s1 }
   0x3   :  { %3506 = sst [smem:[#allocation10_spill]] %s3484_s2 }
   0x4   :  { %3507 = sst [smem:[#allocation11_spill]] %s3488_s6 }
   0x5   :  { %3508 = sst [smem:[#allocation12_spill]] %s3489_s7 }
   0x6   :  { %3509 = sst [smem:[#allocation13_spill]] %s3491_s9 }
   0x7   :  { %3510 = sst [smem:[#allocation14_spill]] %s3498_s16 }
   0x8 LB: > { %3511 = sst [smem:[#allocation4_spill]] %s2924_s22  ;;  %s35_s24 = sadd.s32 1, %s2924_s22  ;;  %s2928_s23 = sphi %s3031_s23, %s26_s23   ;;  %s2924_s22 = sphi %s3029_s22, %s3529_s22   ;;  %s2920_s21 = sphi %s3027_s21, %s3528_s21  }
   0x9   : > { %3512 = sst [smem:[#allocation5_spill]] %s2928_s23  ;;  %p2613_p0 = scmp.ge.s32.totalorder %s2928_s23, 1 }
   0xa   : > { %p36_p1 = scmp.ge.s32.totalorder %s35_s24, 2  ;;  %p597_p2 = scmp.lt.s32.totalorder %s2928_s23, 3 }
   0xc   : > { %s3531_s24 = smov (%p36_p1, %s35_s24), 0  ;;  %p598_p3 = pnand %p2613_p0, %p597_p2 }
   0xd   : > { %3513 = sst [smem:[#allocation6_spill]] %s3531_s24 }
   0xe   : > { %601 = sbr.rel (%p598_p3) target bundleno = 3870 (0xf1e), region = 84 }
  0x15   : > { %p723_p4 = scmp.lt.s32.totalorder %s2920_s21, 1  ;;  %s3514_s6 = sld [smem:[#allocation11_spill]] }
  0x16   : > { %s3516_s7 = sld [smem:[#allocation12_spill]]  ;;  %s3517_s9 = sld [smem:[#allocation13_spill]] }
  0x17   : > { %s3049_s25 = scalar_select %p723_p4, %s2920_s21, 1 }
  0x18   : > { %p2624_p5 = scmp.ne.s32.totalorder %s2920_s21, 0 }
  0x19   : > { %s2614_s26 = sshll.u32 %s3049_s25, 1  ;;  %s2663_s27 = sshll.u32 %s3049_s25, 4  ;;  %v774_v1 = vld [vmem:[%s3486_s4] sm:$0xff] (!%p2624_p5)  ;;  %vm778_vm0 = vcmask (!%p2624_p5), 261120   ;;  %v806_v7 = vlaneseq (!%p2624_p5)  ;;  %v2930_v12 = vmov (!%p2624_p5), 0   ;;  %vm847_vm6 = vcmask (!%p2624_p5), 64512  }
  0x1a   : > { %s754_s22 = scalar_lea.vmem %s3495_s13, %s3049_s25  ;;  %s2666_s23 = sshll.u32 %s3049_s25, 6  ;;  %v820_v8 = vld [vmem:[%s3485_s3] sm:$0x1] (!%p2624_p5)  ;;  %v821_v9 = vld [vmem:[%s3485_s3 + $0x1] sm:$0x1] (!%p2624_p5) }
  0x1b   : > { %s3056_s30 = scalar_lea.vmem %s3514_s6, %s2614_s26  ;;  %s762_s1 = scalar_lea.vmem %s3497_s15, %s3049_s25  ;;  %vm827_vm1 = vcmp.ne.f32.partialorder (!%p2624_p5), %v820_v8, 0.0  ;;  %vm828_vm2 = vcmp.ne.f32.partialorder (!%p2624_p5), %v821_v9, 0.0  ;;  %v807_v10 = vshrl.u32 (!%p2624_p5), %v806_v7, 7  ;;  %v825_v11 = vand.u32 (!%p2624_p5), 127, %v806_v7  ;;  %v777_v37 = vld [vmem:[%s3487_s5] sm:$0x3] (!%p2624_p5) }
  0x1c   : > { %3515 = sst [smem:[#allocation7_spill]] %s3056_s30  ;;  %s3061_s18 = scalar_lea.vmem %s3516_s7, %s2663_s27  ;;  %v831_v13 = vsel (!%p2624_p5), %vm827_vm1, 1, %v2930_v12  ;;  %v832_v14 = vsel (!%p2624_p5), %vm828_vm2, 1, %v2930_v12  ;;  %v2931_v18 = vmov (!%p2624_p5), -1e+09  }
  0x1d   : > { %s3070_s16 = scalar_lea.vmem %s3517_s9, %s2663_s27  ;;  %s3079_s30 = scalar_lea.vmem %s3493_s11, %s2614_s26  ;;  %v808_v15 = vsub.s32 (!%p2624_p5), 0, %v807_v10  ;;  %vm826_vm3 = vcmp.le.s32.totalorder (!%p2624_p5), %v825_v11, %v807_v10  ;;  %v814_v38 = vsub.s32 (!%p2624_p5), 1, %v807_v10 }
  0x1e   : > { %s3084_s7 = scalar_lea.vmem %s3494_s12, %s2663_s27  ;;  %s3098_s6 = scalar_lea.vmem %s3496_s14, %s2666_s23 }
  0x1f   : > { %771 = sbr.rel (%p2624_p5) target bundleno = 358 (0x166), region = 88  ;;  %s3518_s29 = sld [smem:[#allocation8_spill]] (!%p2624_p5)  ;;  %v836_v16 = vrot.slane (!%p2624_p5), %v831_v13, %v808_v15  ;;  %v840_v17 = vrot.slane (!%p2624_p5), %v832_v14, %v808_v15  ;;  %v809_v39 = vrot.slane (!%p2624_p5), %v777_v37, %v808_v15  ;;  %v815_v41 = vrot.slane (!%p2624_p5), %v777_v37, %v814_v38 }
  0x21   : > { %vm841_vm4 = vcmp.eq.s32.totalorder (!%p2624_p5), %v836_v16, 1  ;;  %vm842_vm5 = vcmp.eq.s32.totalorder (!%p2624_p5), %v840_v17, 1 }
  0x22   : > { %vm843_vm7 = vmand (!%p2624_p5), %vm826_vm3, %vm841_vm4 }
  0x23   : > { %vm844_vm8 = vmand (!%p2624_p5), %vm826_vm3, %vm842_vm5  ;;  %v845_v19 = vsel (!%p2624_p5), %vm843_vm7, 0.0, %v2931_v18 }
  0x24   : > { %v846_v20 = vsel (!%p2624_p5), %vm844_vm8, 0.0, %v2931_v18  ;;  %848 = vst.msk [vmem:[#allocation3] sm:$0xff] (!%p2624_p5), %vm847_vm6, %v845_v19 }
  0x25   : > { %v772_v0 = vld [vmem:[%s3518_s29] sm:$0xff] (!%p2624_p5)  ;;  %v773_v2 = vld [vmem:[%s3518_s29 + $0x8] sm:$0xff] (!%p2624_p5)  ;;  %849 = vst.msk [vmem:[#allocation3 + $0x8] sm:$0xff] (!%p2624_p5), %vm847_vm6, %v846_v20 }
  0x26   : > { %v775_v3 = vadd.f32 %v774_v1, %v772_v0  ;;  %v776_v4 = vadd.f32 %v774_v1, %v773_v2 }
  0x28   : > { %v779_v5 = vsel %vm778_vm0, %v775_v3, 0.0  ;;  %v782_v6 = vsel %vm778_vm0, %v776_v4, 0.0 }
  0x29   : > { %780 = vadd.xlane.f32.xlu0 %v779_v5 }
  0x2d   : > { %783 = vadd.xlane.f32.xlu0 %v782_v6 }
  0xb6   : > { %v781_v21 = vpop.xlane.xlu0 %780 }
  0xb7   : > { %v786_v22 = vmul.f32 0.03125, %v781_v21 }
  0xb9   : > { %v788_v23 = vsub.f32 %v775_v3, %v786_v22 }
  0xba   : > { %v784_v24 = vpop.xlane.xlu0 %783 }
  0xbb   : > { %v787_v25 = vmul.f32 0.03125, %v784_v24  ;;  %v790_v26 = vmul.f32 %v788_v23, %v788_v23 }
  0xbd   : > { %v789_v27 = vsub.f32 %v776_v4, %v787_v25  ;;  %v792_v28 = vsel %vm778_vm0, %v790_v26, 0.0 }
  0xbe   : > { %793 = vadd.xlane.f32.xlu1 %v792_v28 }
  0xbf   : > { %v791_v29 = vmul.f32 %v789_v27, %v789_v27 }
  0xc1   : > { %v795_v30 = vsel %vm778_vm0, %v791_v29, 0.0 }
  0xc2   : > { %796 = vadd.xlane.f32.xlu1 %v795_v30 }
 0x14b   : > { %v794_v31 = vpop.xlane.xlu1 %793 }
 0x14c   : > { %v798_v32 = vmul.f32 0.03125, %v794_v31 }
 0x14e   : > { %v800_v33 = vadd.f32 1e-05, %v798_v32 }
 0x14f   : > { %v797_v34 = vpop.xlane.xlu1 %796 }
 0x150   : > { %2842 = vrsqrt.f32 %v800_v33  ;;  %v799_v35 = vmul.f32 0.03125, %v797_v34 }
 0x152   : > { %v801_v36 = vadd.f32 1e-05, %v799_v35 }
 0x154   : > { %2844 = vrsqrt.f32 %v801_v36 }
 0x15a   : > { %v2843_v40 = vpop.eup %2842 }
 0x15b   : > { %v804_v42 = vmul.f32 %v2843_v40, %v788_v23 }
 0x15d   : > { %v810_v43 = vmul.f32 %v809_v39, %v804_v42 }
 0x15e   : > { %v2845_v44 = vpop.eup %2844 }
 0x15f   : > { %v816_v45 = vadd.f32 %v815_v41, %v810_v43  ;;  %v805_v46 = vmul.f32 %v2845_v44, %v789_v27 }
 0x161   : > { %818 = vst.msk [vmem:[#allocation2] sm:$0xff] %vm778_vm0, %v816_v45  ;;  %v811_v47 = vmul.f32 %v809_v39, %v805_v46 }
 0x163   : > { %v817_v48 = vadd.f32 %v815_v41, %v811_v47 }
 0x165   : > { %819 = vst.msk [vmem:[#allocation2 + $0x8] sm:$0xff] %vm778_vm0, %v817_v48 }
 0x166 PF: > { %vm888_vm9 = vcmask 261120   ;;  %v2846_v63 = vld [vmem:[%s3061_s18] sm:$0xff]   ;;  %v2932_v0 = vmov 0.0   ;;  %v2847_v1 = vld [vmem:[%s3061_s18 + $0x8] sm:$0xff]   ;;  %vm2933_vm10 = vmmov 0   ;;  %s3519_s27 = sld [smem:[#allocation7_spill]]  ;;  %v916_v6 = vlaneseq  ;;  %s3520_s17 = scalar_lea.vmem %s3490_s8, %s3049_s25 }
 0x167   : > { %2704 = vmatprep.subr.bf16.mxu1 %v2932_v0  ;;  %2730 = vmatprep.subr.bf16.mxu0 %v2932_v0  ;;  %v2625_v24 = vld [vmem:[%s3520_s17] ss:$0 sm:$0xff]  ;;  %s2934_s19 = smov 96   ;;  %vm999_vm11 = vcmask 130048   ;;  %vm1098_vm12 = vcmask 64512   ;;  %s2935_s9 = smov 64  }
 0x168   : > { %v3125_v49 = vld [vmem:[#allocation2] sm:$0xff]  ;;  %2705 = vmatpush3.bf16.msra.mxu1 %v2846_v63  ;;  %2708 = vmatprep.mubr.msk.bf16.mxu1 %vm2933_vm10, %v2932_v0  ;;  %v3148_v9 = vshrl.u32 %v916_v6, 7  ;;  %s2936_s24 = smov 80   ;;  %vm1128_vm13 = vcmask 1043456   ;;  %s2937_s28 = smov 112  }
 0x169   : > { %v889_v51 = vsel %vm888_vm9, %v3125_v49, 0.0  ;;  %2706 = vmatprep.subr.bf16.mxu1 %v2932_v0  ;;  %2732 = vmatprep.mubr.msk.bf16.mxu0 %vm2933_vm10, %v2932_v0  ;;  %s2938_s20 = smov 48   ;;  %s3521_s2 = scalar_lea.vmem %s3492_s10, %s3049_s25 }
 0x16a   : > { %890 = vadd.xlane.f32.xlu0 %v889_v51  ;;  %v3151_v10 = vsub.s32 0, %v3148_v9  ;;  %v3156_v15 = vsub.s32 1, %v3148_v9  ;;  %p2657_p6 = scmp.ne.s32.totalorder %s2920_s21, 1 }
 0x16b   : > { %v3185_v38 = vld [vmem:[#allocation3] sm:$0xff]  ;;  %s3523_s0 = sld [smem:[#allocation9_spill]] (!%p2657_p6)  ;;  %vm2069_vm4 = vcmask (!%p2657_p6), 58368   ;;  %vm2382_vm5 = vcmp.eq.s32.totalorder (!%p2657_p6), %v3148_v9, 0  ;;  %vm2385_vm6 = vcmp.eq.s32.totalorder (!%p2657_p6), %v3148_v9, 1  ;;  %vm2389_vm7 = vcmp.eq.s32.totalorder (!%p2657_p6), %v3148_v9, 2 }
 0x16c   : > { %v3127_v50 = vld [vmem:[#allocation2 + $0x8] sm:$0xff]  ;;  %2707 = vmatpush3.bf16.msra.mxu1 %v2847_v1  ;;  %v854_v11 = vld [vmem:[%s3519_s27] sm:$0x3]  ;;  %v3189_v46 = vld [vmem:[#allocation3 + $0x8] sm:$0xff] }
 0x16d   : > { %v892_v52 = vsel %vm888_vm9, %v3127_v50, 0.0  ;;  %2712 = vmatprep.subr.bf16.mxu1 %v2932_v0  ;;  %v919_v14 = vrot.slane %v854_v11, %v3151_v10  ;;  %v925_v19 = vrot.slane %v854_v11, %v3156_v15 }
 0x16e   : > { %893 = vadd.xlane.f32.xlu0 %v892_v52 }
 0x1f7   : > { %v891_v53 = vpop.xlane.xlu0 %890 }
 0x1f8   : > { %v896_v54 = vmul.f32 0.03125, %v891_v53 }
 0x1fa   : > { %v898_v55 = vsub.f32 %v3125_v49, %v896_v54 }
 0x1fb   : > { %v894_v56 = vpop.xlane.xlu0 %893 }
 0x1fc   : > { %v897_v57 = vmul.f32 0.03125, %v894_v56  ;;  %v900_v58 = vmul.f32 %v898_v55, %v898_v55 }
 0x1fe   : > { %v899_v59 = vsub.f32 %v3127_v50, %v897_v57  ;;  %v902_v60 = vsel %vm888_vm9, %v900_v58, 0.0 }
 0x1ff   : > { %903 = vadd.xlane.f32.xlu1 %v902_v60 }
 0x200   : > { %v901_v61 = vmul.f32 %v899_v59, %v899_v59 }
 0x202   : > { %v905_v62 = vsel %vm888_vm9, %v901_v61, 0.0 }
 0x203   : > { %906 = vadd.xlane.f32.xlu1 %v905_v62 }
 0x28c   : > { %v904_v2 = vpop.xlane.xlu1 %903 }
 0x28d   : > { %v908_v3 = vmul.f32 0.03125, %v904_v2 }
 0x28f   : > { %v910_v4 = vadd.f32 1e-05, %v908_v3 }
 0x290   : > { %v907_v5 = vpop.xlane.xlu1 %906 }
 0x291   : > { %2860 = vrsqrt.f32 %v910_v4  ;;  %v909_v7 = vmul.f32 0.03125, %v907_v5 }
 0x293   : > { %v911_v8 = vadd.f32 1e-05, %v909_v7 }
 0x295   : > { %2862 = vrsqrt.f32 %v911_v8 }
 0x29b   : > { %v2861_v12 = vpop.eup %2860 }
 0x29c   : > { %v914_v13 = vmul.f32 %v2861_v12, %v898_v55 }
 0x29e   : > { %v920_v18 = vmul.f32 %v919_v14, %v914_v13 }
 0x29f   : > { %v2863_v16 = vpop.eup %2862 }
 0x2a0   : > { %v915_v17 = vmul.f32 %v2863_v16, %v899_v59  ;;  %v926_v21 = vadd.f32 %v925_v19, %v920_v18 }
 0x2a2   : > { %v921_v20 = vmul.f32 %v919_v14, %v915_v17 }
 0x2a4   : > { %v927_v22 = vadd.f32 %v925_v19, %v921_v20 }
 0x2a6   : > { %v928_v23 = vpack.c.bf16 %v927_v22, %v926_v21 }
 0x2a8   : > { %2709 = vmatmul.mubr.msk.bf16.vlgmr.msra.gmra.mrb[0].mxu1 %vm888_vm9, %v928_v23 }
 0x2a9   : > { %2714 = vmatprep.mubr.msk.bf16.mxu1 %vm2933_vm10, %v2932_v0 }
 0x37b   : > { %v984_v25 = vpop.f32.mrb[0].mxu1 }
 0x37c   : > { %v985_v26 = vadd.f32 %v2625_v24, %v984_v25  ;;  %v2710_v27 = vpop.f32.mrb[1].mxu1 }
 0x37d   : > { %v987_v28 = vpop.f32.mrb[2].mxu1 }
 0x37e   : > { %v3167_v29 = vpack.c.bf16 %v985_v26, %v985_v26  ;;  %v988_v30 = vadd.f32 %v2625_v24, %v987_v28  ;;  %v2711_v31 = vpop.f32.mrb[3].mxu1 }
 0x380   : > { %v3169_v32 = vpack.c.bf16 %v988_v30, %v988_v30  ;;  %997 = vrot.lane.b32.xlu0 %v3167_v29, %s2934_s19 }
 0x382   : > { %1046 = vrot.lane.b32.xlu1 %v3169_v32, %s2934_s19 }
 0x3f2   : > { %v998_v33 = vpop.permute.xlu0 %997 }
 0x3f3   : > { %v1004_v34 = vsel %vm999_vm11, %v998_v33, 0 }
 0x3f4   : > { %2713 = vmatpush3.bf16.xpose.msra.mxu1 %v1004_v34  ;;  %v1047_v35 = vpop.permute.xlu1 %1046 }
 0x3f5   : > { %2718 = vmatprep.subr.bf16.mxu1 %v2932_v0  ;;  %v1052_v36 = vsel %vm999_vm11, %v1047_v35, 0 }
 0x3fb   : > { %2715 = vmatmul.mubr.msk.bf16.vlgmr.msra.gmra.mrb[4].mxu1 %vm999_vm11, %v3167_v29 }
 0x3fc   : > { %2719 = vmatpush3.bf16.xpose.msra.mxu1 %v1052_v36  ;;  %2720 = vmatprep.mubr.msk.bf16.mxu1 %vm2933_vm10, %v2932_v0 }
 0x3fd   : > { %2724 = vmatprep.subr.bf16.mxu1 %v2932_v0 }
 0x403   : > { %2721 = vmatmul.mubr.msk.bf16.vlgmr.msra.gmra.mrb[8].mxu1 %vm999_vm11, %v3169_v32 }
 0x404   : > { %2726 = vmatprep.mubr.msk.bf16.mxu1 %vm2933_vm10, %v2932_v0 }
 0x4ce   : > { %v1040_v37 = vpop.f32.mrb[4].mxu1 }
 0x4cf   : > { %v1094_v39 = vmul.f32 0.25, %v1040_v37  ;;  %v2716_v40 = vpop.f32.mrb[5].mxu1 }
 0x4d0   : > { %v1043_v41 = vpop.f32.mrb[6].mxu1 }
 0x4d1   : > { %v2717_v42 = vpop.f32.mrb[7].mxu1  ;;  %v1096_v43 = vadd.f32 %v1094_v39, %v3185_v38 }
 0x4d3   : > { %v1099_v44 = vsel %vm1098_vm12, %v1096_v43, -inf }
 0x4d4   : > { %1100 = vmax.xlane.f32.xlu1 %v1099_v44 }
 0x4d6   : > { %v1088_v45 = vpop.f32.mrb[8].mxu1 }
 0x4d7   : > { %v1095_v47 = vmul.f32 0.25, %v1088_v45  ;;  %v2722_v48 = vpop.f32.mrb[9].mxu1 }
 0x4d8   : > { %v1091_v51 = vpop.f32.mrb[10].mxu1 }
 0x4d9   : > { %v2723_v52 = vpop.f32.mrb[11].mxu1  ;;  %v1097_v53 = vadd.f32 %v1095_v47, %v3189_v46 }
 0x4db   : > { %v1102_v54 = vsel %vm1098_vm12, %v1097_v53, -inf }
 0x4dc   : > { %1103 = vmax.xlane.f32.xlu0 %v1102_v54 }
 0x4e5   : > { %1172 = vrot.lane.b32.xlu1 %v3169_v32, %s2935_s9 }
 0x4e9   : > { %1223 = vrot.lane.b32.xlu1 %v3167_v29, %s2936_s24 }
 0x561   : > { %v1101_v55 = vpop.xlane.xlu1 %1100 }
 0x562   : > { %v1105_v56 = vsub.f32 %v1096_v43, %v1101_v55 }
 0x564   : > { %v1107_v57 = vmul.f32 1.442695, %v1105_v56 }
 0x565   : > { %v1173_v58 = vpop.permute.xlu1 %1172 }
 0x566   : > { %2864 = vpow2.f32 %v1107_v57  ;;  %v1178_v59 = vsel %vm1128_vm13, %v1173_v58, 0 }
 0x567   : > { %2731 = vmatpush3.bf16.msra.mxu0 %v1178_v59 }
 0x568   : > { %2742 = vmatprep.subr.bf16.mxu0 %v2932_v0 }
 0x569   : > { %v1104_v60 = vpop.xlane.xlu0 %1103  ;;  %v1224_v5 = vpop.permute.xlu1 %1223 }
 0x56a   : > { %v1106_v61 = vsub.f32 %v1097_v53, %v1104_v60  ;;  %v1229_v16 = vsel %vm999_vm11, %v1224_v5, 0 }
 0x56c   : > { %v1109_v62 = vmul.f32 1.442695, %v1106_v61 }
 0x56e   : > { %2866 = vpow2.f32 %v1109_v62 }
 0x570   : > { %v2865_v63 = vpop.eup %2864 }
 0x571   : > { %v1111_v1 = vsel %vm1098_vm12, %v2865_v63, 0.0 }
 0x572   : > { %1112 = vadd.xlane.f32.xlu0 %v1111_v1 }
 0x578   : > { %v2867_v2 = vpop.eup %2866 }
 0x579   : > { %v1114_v3 = vsel %vm1098_vm12, %v2867_v2, 0.0 }
 0x57a   : > { %1115 = vadd.xlane.f32.xlu1 %v1114_v3 }
 0x588   : > { %1123 = vrot.lane.b32.xlu0 %v3167_v29, %s2935_s9 }
 0x58b   : > { %1273 = vrot.lane.b32.xlu1 %v3169_v32, %s2936_s24 }
 0x58c   : > { %1221 = vrot.lane.b32.xlu0 %v3167_v29, %s2937_s28 }
 0x58f   : > { %1271 = vrot.lane.b32.xlu1 %v3169_v32, %s2937_s28 }
 0x5ff   : > { %v1113_v4 = vpop.xlane.xlu0 %1112 }
 0x600   : > { %2868 = vrcp.f32 %v1113_v4 }
 0x603   : > { %v1124_v7 = vpop.permute.xlu0 %1123 }
 0x604   : > { %v1130_v8 = vsel %vm1128_vm13, %v1124_v7, 0 }
 0x605   : > { %2725 = vmatpush3.bf16.msra.mxu1 %v1130_v8  ;;  %v2848_v8 = vld [vmem:[%s3070_s16] sm:$0xff]  }
 0x606   : > { %2736 = vmatprep.subr.bf16.mxu1 %v2932_v0 }
 0x607   : > { %v1116_v11 = vpop.xlane.xlu1 %1115  ;;  %v1222_v21 = vpop.permute.xlu0 %1221 }
 0x608   : > { %2870 = vrcp.f32 %v1116_v11 }
 0x60a   : > { %v2869_v12 = vpop.eup %2868 }
 0x60b   : > { %v1119_v13 = vmul.f32 %v2869_v12, %v2865_v63  ;;  %v1274_v19 = vpop.permute.xlu1 %1273  ;;  %v2849_v12 = vld [vmem:[%s3070_s16 + $0x8] sm:$0xff]  }
 0x60c   : > { %v1279_v22 = vsel %vm999_vm11, %v1274_v19, 0 }
 0x60d   : > { %v1121_v14 = vpack.c.bf16 %v1119_v13, %v1119_v13 }
 0x60f   : > { %2727 = vmatmul.mubr.msk.bf16.vlgmr.msra.gmra.mrb[12].mxu1 %vm1098_vm12, %v1121_v14  ;;  %v1272_v23 = vpop.permute.xlu1 %1271 }
 0x610   : > { %2737 = vmatpush3.bf16.xpose.msra.mxu1 %v1229_v16  ;;  %2738 = vmatprep.mubr.msk.bf16.mxu1 %vm2933_vm10, %v2932_v0 }
 0x611   : > { %2748 = vmatprep.subr.bf16.mxu1 %v2932_v0 }
 0x612   : > { %v2871_v17 = vpop.eup %2870 }
 0x613   : > { %v1120_v18 = vmul.f32 %v2871_v17, %v2867_v2 }
 0x615   : > { %v1122_v20 = vpack.c.bf16 %v1120_v18, %v1120_v18 }
 0x617   : > { %2733 = vmatmul.mubr.msk.bf16.vlgmr.msra.gmra.mrb[0].mxu0 %vm1098_vm12, %v1122_v20  ;;  %2739 = vmatmul.mubr.msk.bf16.vlgmr.msra.gmra.mrb[16].mxu1 %vm999_vm11, %v1222_v21 }
 0x618   : > { %2743 = vmatpush3.bf16.xpose.msra.mxu0 %v1279_v22  ;;  %2744 = vmatprep.mubr.msk.bf16.mxu0 %vm2933_vm10, %v2932_v0 }
 0x619   : > { %2754 = vmatprep.subr.bf16.mxu0 %v2932_v0  ;;  %2750 = vmatprep.mubr.msk.bf16.mxu1 %vm2933_vm10, %v2932_v0 }
 0x61f   : > { %2745 = vmatmul.mubr.msk.bf16.vlgmr.msra.gmra.mrb[4].mxu0 %vm999_vm11, %v1272_v23 }
 0x620   : > { %2756 = vmatprep.mubr.msk.bf16.mxu0 %vm2933_vm10, %v2932_v0 }
 0x6e2   : > { %v3221_v24 = vpop.f32.mrb[12].mxu1 }
 0x6e3   : > { %v2728_v25 = vpop.f32.mrb[13].mxu1 }
 0x6e4   : > { %v1169_v26 = vpop.f32.mrb[14].mxu1 }
 0x6e5   : > { %v2729_v27 = vpop.f32.mrb[15].mxu1 }
 0x6ea   : > { %v3223_v28 = vpop.f32.mrb[0].mxu0  ;;  %v1265_v30 = vpop.f32.mrb[16].mxu1 }
 0x6eb   : > { %v1220_v31 = vpack.c.bf16 %v3223_v28, %v3221_v24  ;;  %v1321_v33 = vmul.f32 0.25, %v1265_v30  ;;  %v2734_v34 = vpop.f32.mrb[1].mxu0  ;;  %v2740_v35 = vpop.f32.mrb[17].mxu1 }
 0x6ec   : > { %v1217_v36 = vpop.f32.mrb[2].mxu0  ;;  %v1268_v37 = vpop.f32.mrb[18].mxu1 }
 0x6ed   : > { %v2735_v39 = vpop.f32.mrb[3].mxu0  ;;  %v2741_v40 = vpop.f32.mrb[19].mxu1  ;;  %v1323_v41 = vadd.f32 %v1321_v33, %v3185_v38 }
 0x6ef   : > { %v1325_v42 = vsel %vm1098_vm12, %v1323_v41, -inf }
 0x6f0   : > { %1326 = vmax.xlane.f32.xlu0 %v1325_v42 }
 0x6f2   : > { %v1315_v43 = vpop.f32.mrb[4].mxu0 }
 0x6f3   : > { %v1322_v44 = vmul.f32 0.25, %v1315_v43  ;;  %v2746_v45 = vpop.f32.mrb[5].mxu0 }
 0x6f4   : > { %v1318_v47 = vpop.f32.mrb[6].mxu0 }
 0x6f5   : > { %v2747_v48 = vpop.f32.mrb[7].mxu0  ;;  %v1324_v51 = vadd.f32 %v1322_v44, %v3189_v46 }
 0x6f7   : > { %v1328_v52 = vsel %vm1098_vm12, %v1324_v51, -inf }
 0x6f8   : > { %1329 = vmax.xlane.f32.xlu1 %v1328_v52 }
 0x709   : > { %1397 = vrot.lane.b32.xlu1 %v3169_v32, %s2938_s20 }
 0x77d   : > { %v1327_v53 = vpop.xlane.xlu0 %1326 }
 0x77e   : > { %v1331_v54 = vsub.f32 %v1323_v41, %v1327_v53 }
 0x780   : > { %v1333_v55 = vmul.f32 1.442695, %v1331_v54  ;;  %v2850_v54 = vld [vmem:[%s3084_s7] sm:$0xff]  }
 0x782   : > { %2872 = vpow2.f32 %v1333_v55  ;;  %v2851_v55 = vld [vmem:[%s3084_s7 + $0x8] sm:$0xff]  }
 0x785   : > { %v1330_v38 = vpop.xlane.xlu1 %1329 }
 0x786   : > { %v1332_v56 = vsub.f32 %v1324_v51, %v1330_v38 }
 0x788   : > { %v1335_v57 = vmul.f32 1.442695, %v1332_v56 }
 0x789   : > { %v1398_v58 = vpop.permute.xlu1 %1397 }
 0x78a   : > { %2874 = vpow2.f32 %v1335_v57  ;;  %v1403_v59 = vsel %vm1128_vm13, %v1398_v58, 0 }
 0x78b   : > { %2755 = vmatpush3.bf16.msra.mxu0 %v1403_v59 }
 0x78c   : > { %v2873_v60 = vpop.eup %2872  ;;  %2766 = vmatprep.subr.bf16.mxu0 %v2932_v0 }
 0x78d   : > { %v1337_v46 = vsel %vm1098_vm12, %v2873_v60, 0.0 }
 0x78e   : > { %1338 = vadd.xlane.f32.xlu0 %v1337_v46  ;;  %v855_v46 = vld [vmem:[%s3079_s30] sm:$0x3] }
 0x794   : > { %v2875_v61 = vpop.eup %2874 }
 0x795   : > { %v1340_v32 = vsel %vm1098_vm12, %v2875_v61, 0.0 }
 0x796   : > { %1341 = vadd.xlane.f32.xlu0 %v1340_v32 }
 0x7ac   : > { %1349 = vrot.lane.b32.xlu0 %v3167_v29, %s2938_s20 }
 0x81b   : > { %v1339_v62 = vpop.xlane.xlu0 %1338 }
 0x81c   : > { %2876 = vrcp.f32 %v1339_v62 }
 0x823   : > { %v1342_v63 = vpop.xlane.xlu0 %1341 }
 0x824   : > { %2878 = vrcp.f32 %v1342_v63 }
 0x826   : > { %v2877_v1 = vpop.eup %2876 }
 0x827   : > { %v1345_v2 = vmul.f32 %v2877_v1, %v2873_v60  ;;  %v1350_v3 = vpop.permute.xlu0 %1349  ;;  %v1591_v1 = vrot.slane %v855_v46, %v3156_v15 }
 0x828   : > { %v1355_v4 = vsel %vm1128_vm13, %v1350_v3, 0 }
 0x829   : > { %2749 = vmatpush3.bf16.msra.mxu1 %v1355_v4  ;;  %v1347_v5 = vpack.c.bf16 %v1345_v2, %v1345_v2 }
 0x82a   : > { %2760 = vmatprep.subr.bf16.mxu1 %v2932_v0 }
 0x82c   : > { %2751 = vmatmul.mubr.msk.bf16.vlgmr.msra.gmra.mrb[20].mxu1 %vm1098_vm12, %v1347_v5 }
 0x82d   : > { %2762 = vmatprep.mubr.msk.bf16.mxu1 %vm2933_vm10, %v2932_v0  ;;  %2761 = vmatpush3.bf16.msra.mxu1 %v2849_v12  ;;  %v2854_v12 = vld [vmem:[%s3098_s6 + $0x10] sm:$0xff]  }
 0x82e   : > { %v2879_v29 = vpop.eup %2878  ;;  %2772 = vmatprep.subr.bf16.mxu1 %v2932_v0 }
 0x82f   : > { %v1346_v7 = vmul.f32 %v2879_v29, %v2875_v61  ;;  %v1585_v61 = vrot.slane %v855_v46, %v3151_v10 }
 0x831   : > { %v1348_v11 = vpack.c.bf16 %v1346_v7, %v1346_v7 }
 0x833   : > { %2757 = vmatmul.mubr.msk.bf16.vlgmr.msra.gmra.mrb[8].mxu0 %vm1098_vm12, %v1348_v11  ;;  %v2853_v11 = vld [vmem:[%s3098_s6 + $0x8] sm:$0xff]  }
 0x834   : > { %2767 = vmatpush3.bf16.msra.mxu0 %v2848_v8  ;;  %2768 = vmatprep.mubr.msk.bf16.mxu0 %vm2933_vm10, %v2932_v0  ;;  %v2852_v8 = vld [vmem:[%s3098_s6] sm:$0xff]  }
 0x835   : > { %2780 = vmatprep.subr.bf16.mxu0 %v2932_v0 }
 0x83b   : > { %2769 = vmatmul.mubr.msk.bf16.vlgmr.msra.gmra.mrb[12].mxu0 %vm999_vm11, %v1220_v31  ;;  %v2643_v31 = vld [vmem:[%s3521_s2] ss:$0 sm:$0xff] }
 0x83c   : > { %2796 = vmatprep.mubr.msk.bf16.mxu0 %vm2933_vm10, %v2932_v0  ;;  %2781 = vmatpush3.bf16.msra.mxu0 %v2852_v8 }
 0x83d   : > { %2782 = vmatprep.subr.bf16.mxu0 %v2932_v0 }
 0x840   : > { %2783 = vmatpush3.bf16.msra.mxu0 %v2853_v11 }
 0x841   : > { %2784 = vmatprep.subr.bf16.mxu0 %v2932_v0 }
 0x844   : > { %2785 = vmatpush3.bf16.msra.mxu0 %v2854_v12 }
 0x845   : > { %2786 = vmatprep.subr.bf16.mxu0 %v2932_v0 }
 0x8ff   : > { %v1391_v13 = vpop.f32.mrb[20].mxu1 }
 0x900   : > { %v2752_v14 = vpop.f32.mrb[21].mxu1 }
 0x901   : > { %v1394_v16 = vpop.f32.mrb[22].mxu1  ;;  %v2856_v14 = vld [vmem:[%s3098_s6 + $0x20] sm:$0xff]  }
 0x902   : > { %v2753_v17 = vpop.f32.mrb[23].mxu1  ;;  %v2857_v16 = vld [vmem:[%s3098_s6 + $0x28] sm:$0xff]  }
 0x903   : > { %v2858_v17 = vld [vmem:[%s3098_s6 + $0x30] sm:$0xff]  }
 0x906   : > { %v1439_v18 = vpop.f32.mrb[8].mxu0 }
 0x907   : > { %v1445_v19 = vpack.c.bf16 %v1439_v18, %v1391_v13  ;;  %v2758_v20 = vpop.f32.mrb[9].mxu0  ;;  %v2855_v13 = vld [vmem:[%s3098_s6 + $0x18] sm:$0xff]  }
 0x908   : > { %v1442_v21 = vpop.f32.mrb[10].mxu0  ;;  %2787 = vmatpush3.bf16.msra.mxu0 %v2855_v13  ;;  %v2859_v18 = vld [vmem:[%s3098_s6 + $0x38] sm:$0xff]   ;;  %s3526_s6 = sld [smem:[#allocation14_spill]] (!%p2657_p6) }
 0x909   : > { %v2759_v22 = vpop.f32.mrb[11].mxu0  ;;  %2763 = vmatmul.mubr.msk.bf16.vlgmr.msra.gmra.mrb[24].mxu1 %vm999_vm11, %v1445_v19  ;;  %2788 = vmatprep.subr.bf16.mxu0 %v2932_v0  ;;  %v2644_v19 = vld [vmem:[%s754_s22] ss:$0 sm:$0xff] }
 0x90a   : > { %2776 = vmatprep.mubr.msk.bf16.mxu1 %vm2933_vm10, %v2932_v0  ;;  %2773 = vmatpush3.bf16.msra.mxu1 %v2850_v54 }
 0x90b   : > { %2774 = vmatprep.subr.bf16.mxu1 %v2932_v0 }
 0x90c   : > { %2789 = vmatpush3.bf16.msra.mxu0 %v2856_v14 }
 0x90d   : > { %2790 = vmatprep.subr.bf16.mxu0 %v2932_v0 }
 0x90e   : > { %v1539_v23 = vpop.f32.mrb[12].mxu0  ;;  %2775 = vmatpush3.bf16.msra.mxu1 %v2851_v55 }
 0x90f   : > { %v2770_v24 = vpop.f32.mrb[13].mxu0 }
 0x910   : > { %v1542_v25 = vpop.f32.mrb[14].mxu0  ;;  %2791 = vmatpush3.bf16.msra.mxu0 %v2857_v16 }
 0x911   : > { %v2771_v26 = vpop.f32.mrb[15].mxu0  ;;  %2792 = vmatprep.subr.bf16.mxu0 %v2932_v0 }
 0x914   : > { %2793 = vmatpush3.bf16.msra.mxu0 %v2858_v17 }
 0x915   : > { %2794 = vmatprep.subr.bf16.mxu0 %v2932_v0 }
 0x918   : > { %2795 = vmatpush3.bf16.msra.mxu0 %v2859_v18 }
 0x9dc   : > { %v1489_v27 = vpop.f32.mrb[24].mxu1 }
 0x9dd   : > { %v1540_v28 = vadd.f32 %v1539_v23, %v1489_v27  ;;  %v2764_v30 = vpop.f32.mrb[25].mxu1 }
 0x9de   : > { %v1492_v33 = vpop.f32.mrb[26].mxu1 }
 0x9df   : > { %v1546_v34 = vadd.f32 %v1540_v28, %v3125_v49  ;;  %v1543_v35 = vadd.f32 %v1542_v25, %v1492_v33  ;;  %v2765_v36 = vpop.f32.mrb[27].mxu1 }
 0x9e1   : > { %v3261_v37 = vadd.f32 %v2643_v31, %v1546_v34  ;;  %v1547_v39 = vadd.f32 %v1543_v35, %v3127_v50 }
 0x9e3   : > { %v3264_v40 = vadd.f32 %v2643_v31, %v1547_v39  ;;  %v1556_v41 = vsel %vm888_vm9, %v3261_v37, 0.0 }
 0x9e4   : > { %1557 = vadd.xlane.f32.xlu1 %v1556_v41 }
 0x9e5   : > { %v1559_v42 = vsel %vm888_vm9, %v3264_v40, 0.0 }
 0x9e6   : > { %1560 = vadd.xlane.f32.xlu0 %v1559_v42 }
 0xa71   : > { %v1558_v43 = vpop.xlane.xlu1 %1557 }
 0xa72   : > { %v1562_v49 = vmul.f32 0.03125, %v1558_v43 }
 0xa73   : > { %v1561_v44 = vpop.xlane.xlu0 %1560 }
 0xa74   : > { %v1564_v45 = vsub.f32 %v3261_v37, %v1562_v49  ;;  %v1563_v47 = vmul.f32 0.03125, %v1561_v44 }
 0xa76   : > { %v1565_v50 = vsub.f32 %v3264_v40, %v1563_v47  ;;  %v1566_v48 = vmul.f32 %v1564_v45, %v1564_v45 }
 0xa78   : > { %v1568_v51 = vsel %vm888_vm9, %v1566_v48, 0.0  ;;  %v1567_v52 = vmul.f32 %v1565_v50, %v1565_v50  ;;  %v2648_v48 = vld [vmem:[%s762_s1] ss:$0 sm:$0xff]  ;;  %s3522_s1 = sld [smem:[#allocation10_spill]] (!%p2657_p6) }
 0xa79   : > { %1569 = vadd.xlane.f32.xlu0 %v1568_v51 }
 0xa7a   : > { %v1571_v53 = vsel %vm888_vm9, %v1567_v52, 0.0 }
 0xa7b   : > { %1572 = vadd.xlane.f32.xlu1 %v1571_v53 }
 0xb06   : > { %v1570_v38 = vpop.xlane.xlu0 %1569 }
 0xb07   : > { %v1574_v56 = vmul.f32 0.03125, %v1570_v38 }
 0xb08   : > { %v1573_v57 = vpop.xlane.xlu1 %1572 }
 0xb09   : > { %v1576_v58 = vadd.f32 1e-05, %v1574_v56  ;;  %v1575_v59 = vmul.f32 0.03125, %v1573_v57 }
 0xb0b   : > { %2880 = vrsqrt.f32 %v1576_v58  ;;  %v1577_v60 = vadd.f32 1e-05, %v1575_v59  ;;  %v1789_v58 = vld [vmem:[%s3522_s1] sm:$0xff] (!%p2657_p6) }
 0xb0c   : > { %v1779_v59 = vld [vmem:[%s3523_s0] sm:$0xff] (!%p2657_p6) }
 0xb0d   : > { %2882 = vrsqrt.f32 %v1577_v60 }
 0xb15   : > { %v2881_v32 = vpop.eup %2880 }
 0xb16   : > { %v1580_v62 = vmul.f32 %v2881_v32, %v1564_v45 }
 0xb17   : > { %v2883_v63 = vpop.eup %2882 }
 0xb18   : > { %v1586_v2 = vmul.f32 %v1585_v61, %v1580_v62  ;;  %v1581_v3 = vmul.f32 %v2883_v63, %v1565_v50 }
 0xb1a   : > { %v1587_v4 = vmul.f32 %v1585_v61, %v1581_v3  ;;  %v1592_v5 = vadd.f32 %v1591_v1, %v1586_v2  ;;  %v1780_v61 = vld [vmem:[%s3523_s0 + $0x8] sm:$0xff] (!%p2657_p6)  ;;  %v2939_v3 = vmov (!%p2657_p6), 0  }
 0xb1b   : > { %2888 = vset.pattern.permute.xlu0 (!%p2657_p6), %v2939_v3  ;;  %2889 = vset.pattern.permute.xlu1 (!%p2657_p6), %v2939_v3 }
 0xb1c   : > { %v1593_v29 = vadd.f32 %v1591_v1, %v1587_v4 }
 0xb1e   : > { %v1594_v7 = vpack.c.bf16 %v1593_v29, %v1592_v5 }
 0xb20   : > { %2777 = vmatmul.mubr.msk.bf16.vlgmr.msra.gmra.mrb[28].mxu1 %vm888_vm9, %v1594_v7 }
 0xbf3   : > { %v1650_v20 = vpop.f32.mrb[28].mxu1 }
 0xbf4   : > { %v1651_v21 = vadd.f32 %v2644_v19, %v1650_v20  ;;  %v2778_v22 = vpop.f32.mrb[29].mxu1 }
 0xbf5   : > { %v1653_v23 = vpop.f32.mrb[30].mxu1 }
 0xbf6   : > { %v1659_v24 = vmul.f32 0.044715, %v1651_v21  ;;  %v1654_v25 = vadd.f32 %v2644_v19, %v1653_v23  ;;  %v2779_v26 = vpop.f32.mrb[31].mxu1  ;;  %v1657_v43 = vmul.f32 0.5, %v1651_v21 }
 0xbf8   : > { %v1661_v27 = vmul.f32 %v1659_v24, %v1651_v21  ;;  %v1660_v28 = vmul.f32 0.044715, %v1654_v25  ;;  %v1658_v49 = vmul.f32 0.5, %v1654_v25 }
 0xbfa   : > { %v1663_v30 = vmul.f32 %v1661_v27, %v1651_v21  ;;  %v1662_v31 = vmul.f32 %v1660_v28, %v1654_v25 }
 0xbfc   : > { %v1665_v33 = vadd.f32 %v1663_v30, %v1651_v21  ;;  %v1664_v34 = vmul.f32 %v1662_v31, %v1654_v25  ;;  %v2940_v31 = vmov (!%p2657_p6), 1966171168  }
 0xbfe   : > { %v1667_v0 = vmul.f32 0.7978846, %v1665_v33  ;;  %v1666_v35 = vadd.f32 %v1664_v34, %v1654_v25  ;;  %v1910_v33 = vunpack.c.l.s4 (!%p2657_p6), %v2940_v31 }
 0xc00   : > { %2884 = vtanh.f32 %v1667_v0  ;;  %v1668_v36 = vmul.f32 0.7978846, %v1666_v35 }
 0xc02   : > { %2886 = vtanh.f32 %v1668_v36  ;;  %v3337_v36 = vsub.s32 (!%p2657_p6), 2, %v3148_v9 }
 0xc0a   : > { %v2885_v39 = vpop.eup %2884 }
 0xc0b   : > { %v1671_v41 = vadd.f32 1.0, %v2885_v39  ;;  %v3340_v39 = vsub.s32 (!%p2657_p6), 3, %v3148_v9 }
 0xc0c   : > { %v2887_v42 = vpop.eup %2886 }
 0xc0d   : > { %v1672_v44 = vadd.f32 1.0, %v2887_v42  ;;  %v1673_v45 = vmul.f32 %v1671_v41, %v1657_v43  ;;  %v3343_v41 = vsub.s32 (!%p2657_p6), 4, %v3148_v9 }
 0xc0f   : > { %v1674_v47 = vmul.f32 %v1672_v44, %v1658_v49  ;;  %v3346_v49 = vsub.s32 (!%p2657_p6), 5, %v3148_v9  ;;  %v1911_v44 = vunpack.c.0.s8 (!%p2657_p6), %v1910_v33 }
 0xc11   : > { %v1675_v50 = vpack.c.bf16 %v1674_v47, %v1673_v45 }
 0xc13   : > { %2797 = vmatmul.mubr.bf16.vlgmr.msra.gmra.mrb[16].mxu0 %v1675_v50 }
 0xce6   : > { %v1764_v51 = vpop.f32.mrb[16].mxu0 }
 0xce7   : > { %v1765_v52 = vadd.f32 %v2648_v48, %v1764_v51  ;;  %v2798_v53 = vpop.f32.mrb[17].mxu0  ;;  %1778 = sbr.rel (%p2657_p6) target bundleno = 3870 (0xf1e), region = 92 }
 0xce8   : > { %v1767_v54 = vpop.f32.mrb[18].mxu0 }
 0xce9   : > { %v1771_v55 = vadd.f32 %v1765_v52, %v3261_v37  ;;  %v1768_v38 = vadd.f32 %v2648_v48, %v1767_v54  ;;  %v2799_v56 = vpop.f32.mrb[19].mxu0  ;;  %v1790_v37 = vld [vmem:[%s3522_s1 + $0x8] sm:$0xff] (!%p2657_p6)  ;;  %v3349_v48 = vsub.s32 (!%p2657_p6), 6, %v3148_v9  ;;  %v3353_v54 = vsub.s32 (!%p2657_p6), 7, %v3148_v9 }
 0xceb   : > { %1773 = vst.msk [vmem:[#allocation2] sm:$0xff] %vm888_vm9, %v1771_v55  ;;  %v1772_v57 = vadd.f32 %v1768_v38, %v3264_v40  ;;  %v1791_v60 = vmul.f32 (!%p2657_p6), %v1789_v58, %v1771_v55  ;;  %v1781_v46 = vmul.f32 (!%p2657_p6), %v1779_v59, %v1771_v55 }
 0xced   : > { %1774 = vst.msk [vmem:[#allocation2 + $0x8] sm:$0xff] %vm888_vm9, %v1772_v57  ;;  %v1792_v40 = vmul.f32 (!%p2657_p6), %v1790_v37, %v1772_v57  ;;  %v1782_v32 = vmul.f32 (!%p2657_p6), %v1780_v61, %v1772_v57  ;;  %v1793_v62 = vsel (!%p2657_p6), %vm888_vm9, %v1791_v60, 0.0  ;;  %v1783_v63 = vsel (!%p2657_p6), %vm888_vm9, %v1781_v46, 0.0 }
 0xcee   : > { %1794 = vadd.xlane.f32.xlu1 %v1793_v62  ;;  %1784 = vadd.xlane.f32.xlu0 %v1783_v63  ;;  %v3359_v46 = vsub.s32 %v1911_v44, %v3148_v9 }
 0xcef   : > { %v1796_v1 = vsel %vm888_vm9, %v1792_v40, 0.0  ;;  %v1786_v2 = vsel %vm888_vm9, %v1782_v32, 0.0 }
 0xcf2   : > { %1797 = vadd.xlane.f32.xlu1 %v1796_v1  ;;  %1787 = vadd.xlane.f32.xlu0 %v1786_v2 }
 0xd7b   : > { %v1795_v4 = vpop.xlane.xlu1 %1794  ;;  %v3327_v5 = vpop.xlane.xlu0 %1784 }
 0xd7c   : > { %v2086_v29 = vand.u32 2147483647, %v1795_v4  ;;  %v1811_v7 = vand.u32 2147483647, %v3327_v5  ;;  %v2080_v42 = vmax.f32 %v1795_v4, 0.0  ;;  %v2082_v43 = vmul.f32 0.0, %v1795_v4 }
 0xd7d   : > { %v1807_v52 = vmax.f32 %v3327_v5, 0.0 }
 0xd7e   : > { %v2088_v8 = vsub.f32 0.0, %v2086_v29  ;;  %v1813_v11 = vsub.f32 0.0, %v1811_v7  ;;  %v2084_v59 = vsub.f32 %v2080_v42, %v2082_v43 }
 0xd7f   : > { %v3330_v12 = vpop.xlane.xlu1 %1797  ;;  %v3332_v13 = vpop.xlane.xlu0 %1787  ;;  %v1809_v1 = vsub.f32 %v1807_v52, %v3327_v5 }
 0xd80   : > { %v2090_v14 = vmul.f32 1.442695, %v2088_v8  ;;  %v2087_v16 = vand.u32 2147483647, %v3330_v12  ;;  %v1815_v17 = vmul.f32 1.442695, %v1813_v11 }
 0xd81   : > { %v1812_v18 = vand.u32 2147483647, %v3332_v13  ;;  %v2081_v38 = vmax.f32 %v3330_v12, 0.0  ;;  %v2083_v56 = vmul.f32 0.0, %v3330_v12  ;;  %v1808_v57 = vmax.f32 %v3332_v13, 0.0 }
 0xd82   : > { %2890 = vpow2.f32 %v2090_v14  ;;  %v2089_v19 = vsub.f32 0.0, %v2087_v16 }
 0xd83   : > { %2892 = vpow2.f32 %v1815_v17  ;;  %v1814_v20 = vsub.f32 0.0, %v1812_v18  ;;  %v2085_v29 = vsub.f32 %v2081_v38, %v2083_v56  ;;  %v1810_v7 = vsub.f32 %v1808_v57, %v3332_v13 }
 0xd84   : > { %v2092_v21 = vmul.f32 1.442695, %v2089_v19 }
 0xd85   : > { %v1817_v22 = vmul.f32 1.442695, %v1814_v20 }
 0xd86   : > { %2894 = vpow2.f32 %v2092_v21 }
 0xd87   : > { %2896 = vpow2.f32 %v1817_v22 }
 0xd8c   : > { %v2891_v23 = vpop.eup %2890 }
 0xd8d   : > { %v2893_v24 = vpop.eup %2892  ;;  %v2094_v25 = vadd.f32 1.0, %v2891_v23  ;;  %v2097_v34 = vmul.f32 -0.5, %v2891_v23  ;;  %v2100_v51 = vand.u32 2147483647, %v2891_v23 }
 0xd8e   : > { %v1819_v26 = vadd.f32 1.0, %v2893_v24  ;;  %v1822_v35 = vmul.f32 -0.5, %v2893_v24  ;;  %v1825_v55 = vand.u32 2147483647, %v2893_v24 }
 0xd8f   : > { %2898 = vlog2.f32 %v2094_v25  ;;  %v2098_v45 = vadd.f32 1.0, %v2097_v34  ;;  %vm2101_vm14 = vcmp.lt.f32.partialorder %v2100_v51, 0.0004427343 }
 0xd90   : > { %v2895_v27 = vpop.eup %2894  ;;  %2900 = vlog2.f32 %v1819_v26  ;;  %v1823_v53 = vadd.f32 1.0, %v1822_v35  ;;  %vm1826_vm15 = vcmp.lt.f32.partialorder %v1825_v55, 0.0004427343 }
 0xd91   : > { %v2897_v28 = vpop.eup %2896  ;;  %v2103_v30 = vadd.f32 1.0, %v2895_v27  ;;  %v2106_v47 = vmul.f32 -0.5, %v2895_v27  ;;  %v2109_v37 = vand.u32 2147483647, %v2895_v27  ;;  %v2099_v32 = vmul.f32 %v2891_v23, %v2098_v45 }
 0xd92   : > { %v1828_v0 = vadd.f32 1.0, %v2897_v28  ;;  %v1831_v50 = vmul.f32 -0.5, %v2897_v28  ;;  %v1834_v60 = vand.u32 2147483647, %v2897_v28  ;;  %v1824_v3 = vmul.f32 %v2893_v24, %v1823_v53 }
 0xd93   : > { %2902 = vlog2.f32 %v2103_v30  ;;  %v2107_v62 = vadd.f32 1.0, %v2106_v47  ;;  %vm2110_vm0 = vcmp.lt.f32.partialorder %v2109_v37, 0.0004427343 }
 0xd94   : > { %2904 = vlog2.f32 %v1828_v0  ;;  %v1832_v63 = vadd.f32 1.0, %v1831_v50  ;;  %vm3365_vm1 = vcmp.lt.f32.partialorder %v1834_v60, 0.0004427343 }
 0xd95   : > { %v2108_v5 = vmul.f32 %v2895_v27, %v2107_v62 }
 0xd96   : > { %v1833_v19 = vmul.f32 %v2897_v28, %v1832_v63 }
 0xd99   : > { %v2899_v58 = vpop.eup %2898 }
 0xd9a   : > { %v2901_v40 = vpop.eup %2900  ;;  %v2096_v61 = vmul.f32 0.6931472, %v2899_v58 }
 0xd9b   : > { %v1821_v2 = vmul.f32 0.6931472, %v2901_v40 }
 0xd9c   : > { %v2102_v4 = vsel %vm2101_vm14, %v2099_v32, %v2096_v61 }
 0xd9d   : > { %v2903_v8 = vpop.eup %2902  ;;  %v3363_v11 = vadd.f32 %v2102_v4, %v2084_v59  ;;  %v1827_v12 = vsel %vm1826_vm15, %v1824_v3, %v1821_v2 }
 0xd9e   : > { %v2905_v16 = vpop.eup %2904  ;;  %v1837_v17 = vadd.f32 %v1827_v12, %v1809_v1  ;;  %v2105_v18 = vmul.f32 0.6931472, %v2903_v8 }
 0xd9f   : > { %v1830_v20 = vmul.f32 0.6931472, %v2905_v16  ;;  %v2119_v21 = vrot.slane %v3363_v11, %v3151_v10  ;;  %v2123_v13 = vrot.slane %v3363_v11, %v3156_v15  ;;  %v2127_v22 = vrot.slane %v3363_v11, %v3337_v36 }
 0xda0   : > { %v2111_v23 = vsel %vm2110_vm0, %v2108_v5, %v2105_v18  ;;  %v1844_v24 = vrot.slane %v1837_v17, %v3151_v10  ;;  %v1848_v25 = vrot.slane %v1837_v17, %v3156_v15  ;;  %v1852_v26 = vrot.slane %v1837_v17, %v3337_v36 }
 0xda1   : > { %v3378_v30 = vadd.f32 %v2111_v23, %v2085_v29  ;;  %v1836_v27 = vsel %vm3365_vm1, %v1833_v19, %v1830_v20  ;;  %v1856_v28 = vrot.slane %v1837_v17, %v3340_v39  ;;  %v1860_v31 = vrot.slane %v1837_v17, %v3343_v41 }
 0xda2   : > { %v1838_v33 = vadd.f32 %v1836_v27, %v1810_v7  ;;  %v1864_v34 = vrot.slane %v1837_v17, %v3346_v49  ;;  %v1868_v0 = vrot.slane %v1837_v17, %v3349_v48  ;;  %v1872_v35 = vrot.slane %v1837_v17, %v3353_v54 }
 0xda3   : > { %v1905_v42 = vcombine.low %v1844_v24, %v1848_v25  ;;  %v1906_v43 = vcombine.low %v1852_v26, %v1856_v28  ;;  %v2131_v44 = vrot.slane %v3363_v11, %v3340_v39  ;;  %v2135_v45 = vrot.slane %v3363_v11, %v3343_v41 }
 0xda4   : > { %v1907_v47 = vcombine.low %v1860_v31, %v1864_v34  ;;  %v1908_v50 = vcombine.low %v1868_v0, %v1872_v35  ;;  %v1876_v51 = vrot.slane %v1838_v33, %v3151_v10  ;;  %v1880_v52 = vrot.slane %v1838_v33, %v3156_v15 }
 0xda5   : > { %v1915_v53 = vrot.slane %v1905_v42, %v3359_v46  ;;  %v1922_v55 = vrot.slane %v1906_v43, %v3359_v46  ;;  %v1884_v38 = vrot.slane %v1838_v33, %v3337_v36  ;;  %v1888_v56 = vrot.slane %v1838_v33, %v3340_v39 }
 0xda6   : > { %v1929_v57 = vrot.slane %v1907_v47, %v3359_v46  ;;  %v1936_v58 = vrot.slane %v1908_v50, %v3359_v46  ;;  %v1892_v59 = vrot.slane %v1838_v33, %v3343_v41  ;;  %v1896_v37 = vrot.slane %v1838_v33, %v3346_v49 }
 0xda7   : > { %v1937_v60 = vcombine.low %v1915_v53, %v1922_v55  ;;  %v1900_v40 = vrot.slane %v1838_v33, %v3349_v48  ;;  %v1904_v61 = vrot.slane %v1838_v33, %v3353_v54  ;;  %v1954_v32 = vcombine.low %v1876_v51, %v1880_v52 }
 0xda8   : > { %v1938_v62 = vcombine.low %v1929_v57, %v1936_v58  ;;  %v1955_v63 = vcombine.low %v1884_v38, %v1888_v56  ;;  %v1956_v1 = vcombine.low %v1892_v59, %v1896_v37  ;;  %v2139_v2 = vrot.slane %v3363_v11, %v3346_v49 }
 0xda9   : > { %v1945_v3 = vrot.slane %v1937_v60, %v3359_v46  ;;  %v1957_v4 = vcombine.low %v1900_v40, %v1904_v61  ;;  %v1964_v29 = vrot.slane %v1954_v32, %v3359_v46  ;;  %v2143_v7 = vrot.slane %v3363_v11, %v3349_v48  ;;  %v1799_v60 = vld [vmem:[%s3485_s3] sm:$0x1]  ;;  %v1800_v40 = vld [vmem:[%s3485_s3 + $0x1] sm:$0x1] }
 0xdaa   : > { %v1952_v8 = vrot.slane %v1938_v62, %v3359_v46  ;;  %v1971_v12 = vrot.slane %v1955_v63, %v3359_v46  ;;  %v1978_v14 = vrot.slane %v1956_v1, %v3359_v46  ;;  %v2147_v16 = vrot.slane %v3363_v11, %v3353_v54 }
 0xdab   : > { %v1985_v17 = vrot.slane %v1957_v4, %v3359_v46  ;;  %v2180_v18 = vcombine.low %v2119_v21, %v2123_v13  ;;  %v2181_v5 = vcombine.low %v2127_v22, %v2131_v44  ;;  %v2182_v19 = vcombine.low %v2135_v45, %v2139_v2 }
 0xdac   : > { %v1953_v20 = vcombine.low %v1945_v3, %v1952_v8  ;;  %v1986_v23 = vcombine.low %v1964_v29, %v1971_v12  ;;  %v2183_v24 = vcombine.low %v2143_v7, %v2147_v16  ;;  %v2151_v25 = vrot.slane %v3378_v30, %v3151_v10 }
 0xdad   : > { %v1987_v26 = vcombine.low %v1978_v14, %v1985_v17  ;;  %v2190_v27 = vrot.slane %v2180_v18, %v3359_v46  ;;  %v2197_v28 = vrot.slane %v2181_v5, %v3359_v46  ;;  %v2204_v31 = vrot.slane %v2182_v19, %v3359_v46 }
 0xdae   : > { %2004 = vperm.xlu0 %2888, %v1953_v20   ;;  %v1994_v11 = vrot.slane %v1986_v23, %v3359_v46  ;;  %v2211_v21 = vrot.slane %v2183_v24, %v3359_v46  ;;  %v2155_v13 = vrot.slane %v3378_v30, %v3156_v15  ;;  %v2159_v22 = vrot.slane %v3378_v30, %v3337_v36 }
 0xdaf   : > { %v2001_v10 = vrot.slane %v1987_v26, %v3359_v46  ;;  %v2212_v33 = vcombine.low %v2190_v27, %v2197_v28  ;;  %v2163_v34 = vrot.slane %v3378_v30, %v3340_v39  ;;  %v2167_v0 = vrot.slane %v3378_v30, %v3343_v41 }
 0xdb0   : > { %v2213_v35 = vcombine.low %v2204_v31, %v2211_v21  ;;  %v2171_v42 = vrot.slane %v3378_v30, %v3346_v49  ;;  %v2175_v43 = vrot.slane %v3378_v30, %v3349_v48  ;;  %v2179_v15 = vrot.slane %v3378_v30, %v3353_v54 }
 0xdb1   : > { %v2002_v36 = vcombine.low %v1994_v11, %v2001_v10  ;;  %v2220_v44 = vrot.slane %v2212_v33, %v3359_v46  ;;  %v2229_v45 = vcombine.low %v2151_v25, %v2155_v13  ;;  %v2230_v47 = vcombine.low %v2159_v22, %v2163_v34 }
 0xdb2   : > { %v2227_v39 = vrot.slane %v2213_v35, %v3359_v46  ;;  %v2231_v50 = vcombine.low %v2167_v0, %v2171_v42  ;;  %v2232_v51 = vcombine.low %v2175_v43, %v2179_v15  ;;  %v2010_v57 = vand.u32 127, %v916_v6 }
 0xdb3   : > { %2007 = vperm.xlu1 %2889, %v2002_v36   ;;  %v2239_v41 = vrot.slane %v2229_v45, %v3359_v46  ;;  %v2246_v49 = vrot.slane %v2230_v47, %v3359_v46  ;;  %vm1801_vm2 = vcmp.ne.f32.partialorder %v1799_v60, 0.0  ;;  %vm1802_vm3 = vcmp.ne.f32.partialorder %v1800_v40, 0.0 }
 0xdb4   : > { %v2253_v52 = vrot.slane %v2231_v50, %v3359_v46  ;;  %v2260_v48 = vrot.slane %v2232_v51, %v3359_v46  ;;  %v2228_v53 = vcombine.low %v2220_v44, %v2227_v39  ;;  %v2013_v58 = vsub.s32 %v2010_v57, %v3148_v9 }
 0xdb5   : > { %v2261_v54 = vcombine.low %v2239_v41, %v2246_v49  ;;  %v2941_v1 = vmov 0.0  }
 0xdb6   : > { %v2262_v30 = vcombine.low %v2253_v52, %v2260_v48  ;;  %v2658_v2 = vsel %vm1801_vm2, 1.0, %v2941_v1  ;;  %v2659_v3 = vsel %vm1802_vm3, 1.0, %v2941_v1 }
 0xdb7   : > { %2279 = vperm.xlu1 %2889, %v2228_v53   ;;  %v2269_v55 = vrot.slane %v2261_v54, %v3359_v46  ;;  %v2354_v8 = vcombine.low %v2658_v2, %v2659_v3 }
 0xdb8   : > { %v2276_v38 = vrot.slane %v2262_v30, %v3359_v46 }
 0xdb9   : > { %v2361_v5 = vrot.slane %v2354_v8, %v3359_v46 }
 0xdba   : > { %v2277_v56 = vcombine.low %v2269_v55, %v2276_v38 }
 0xdbb   : > { %v2368_v26 = vrot.slane %v2361_v5, %v3359_v46 }
 0xdbc   : > { %2282 = vperm.xlu1 %2889, %v2277_v56  }
 0xdbd   : > { %v2370_v21 = vsel %vm2069_vm4, %v2368_v26, 0.0 }
 0xe2d   : > { %v2005_v59 = vpop.permute.xlu0 %2004 }
 0xe2e   : > { %v2014_v37 = vrot.slane %v2005_v59, %v2013_v58 }
 0xe30   : > { %v2025_v61 = vrot.slane %v2014_v37, %v3359_v46 }
 0xe32   : > { %v2008_v32 = vpop.permute.xlu1 %2007  ;;  %v2032_v6 = vrot.slane %v2025_v61, %v3359_v46 }
 0xe33   : > { %v2018_v62 = vrot.slane %v2008_v32, %v2013_v58 }
 0xe34   : > { %v2049_v12 = vmul.f32 %v2658_v2, %v2032_v6 }
 0xe35   : > { %v2039_v63 = vrot.slane %v2018_v62, %v3359_v46 }
 0xe36   : > { %v2280_v4 = vpop.permute.xlu1 %2279 }
 0xe37   : > { %v2046_v29 = vrot.slane %v2039_v63, %v3359_v46  ;;  %v2287_v7 = vrot.slane %v2280_v4, %v2013_v58 }
 0xe39   : > { %v2050_v14 = vmul.f32 %v2659_v3, %v2046_v29  ;;  %v2298_v16 = vrot.slane %v2287_v7, %v3359_v46 }
 0xe3b   : > { %v2283_v17 = vpop.permute.xlu1 %2282  ;;  %v2053_v18 = vcombine.low %v2049_v12, %v2050_v14  ;;  %v2305_v23 = vrot.slane %v2298_v16, %v3359_v46 }
 0xe3c   : > { %v2291_v19 = vrot.slane %v2283_v17, %v2013_v58 }
 0xe3d   : > { %v2060_v20 = vrot.slane %v2053_v18, %v3359_v46  ;;  %v2322_v31 = vmul.f32 %v2658_v2, %v2305_v23 }
 0xe3e   : > { %v2312_v24 = vrot.slane %v2291_v19, %v3359_v46 }
 0xe3f   : > { %v2067_v25 = vrot.slane %v2060_v20, %v3359_v46 }
 0xe40   : > { %v2319_v27 = vrot.slane %v2312_v24, %v3359_v46 }
 0xe41   : > { %v2070_v28 = vsel %vm2069_vm4, %v2067_v25, 0.0 }
 0xe42   : > { %v2323_v11 = vmul.f32 %v2659_v3, %v2319_v27  ;;  %2071 = vadd.xlane.f32.xlu1 %v2070_v28 }
 0xe44   : > { %v2326_v13 = vcombine.low %v2322_v31, %v2323_v11 }
 0xe46   : > { %2371 = vadd.xlane.f32.xlu1 %v2370_v21  ;;  %v2333_v22 = vrot.slane %v2326_v13, %v3359_v46 }
 0xe48   : > { %v2340_v10 = vrot.slane %v2333_v22, %v3359_v46 }
 0xe4a   : > { %v2342_v33 = vsel %vm2069_vm4, %v2340_v10, 0.0 }
 0xe4b   : > { %2343 = vadd.xlane.f32.xlu0 %v2342_v33 }
 0xecf   : > { %v2072_v34 = vpop.xlane.xlu1 %2071 }
 0xed0   : > { %v2073_v0 = vrot.slane %v2072_v34, 4 }
 0xed2   : > { %v2074_v35 = vadd.f32 %v2073_v0, %v2072_v34 }
 0xed3   : > { %v2372_v42 = vpop.xlane.xlu1 %2371 }
 0xed4   : > { %v2075_v43 = vrot.slane %v2074_v35, 2  ;;  %v2373_v15 = vrot.slane %v2372_v42, 4 }
 0xed6   : > { %v2374_v36 = vadd.f32 %v2373_v15, %v2372_v42  ;;  %v2076_v44 = vadd.f32 %v2075_v43, %v2074_v35 }
 0xed8   : > { %v2375_v45 = vrot.slane %v2374_v36, 2  ;;  %v2344_v47 = vpop.xlane.xlu0 %2343  ;;  %v2077_v39 = vrot.slane %v2076_v44, 1 }
 0xed9   : > { %v2345_v50 = vrot.slane %v2344_v47, 4 }
 0xeda   : > { %v2078_v51 = vadd.f32 %v2077_v39, %v2076_v44  ;;  %v2376_v49 = vadd.f32 %v2375_v45, %v2374_v36 }
 0xedb   : > { %v2346_v41 = vadd.f32 %v2345_v50, %v2344_v47 }
 0xedc   : > { %2800 = vpush %v2078_v51  ;;  %v2377_v48 = vrot.slane %v2376_v49, 1 }
 0xedd   : > { %v2347_v52 = vrot.slane %v2346_v41, 2 }
 0xede   : > { %v2378_v30 = vadd.f32 %v2377_v48, %v2376_v49 }
 0xedf   : > { %v2348_v46 = vadd.f32 %v2347_v52, %v2346_v41 }
 0xee1   : > { %v2349_v53 = vrot.slane %v2348_v46, 1 }
 0xee3   : > { %v2350_v54 = vadd.f32 %v2349_v53, %v2348_v46 }
 0xee5   : > { %2802 = vpush %v2350_v54 }
 0xee6   : > { %2804 = vpush %v2378_v30 }
 0xf0d   : > { %s2801_s23 = spop %2800 }
 0xf0e   : > { %v2383_v55 = vstv %s2801_s23 }
 0xf0f   : > { %v2384_v56 = vsel %vm2382_vm5, %v2383_v55, 0.0 }
 0xf16   : > { %s2803_s2 = spop %2802 }
 0xf17   : > { %v2386_v38 = vstv %s2803_s2  ;;  %s2805_s7 = spop %2804 }
 0xf18   : > { %v2387_v57 = vsel %vm2385_vm6, %v2386_v38, 0.0  ;;  %v2390_v58 = vstv %s2805_s7 }
 0xf19   : > { %v2388_v59 = vadd.f32 %v2387_v57, %v2384_v56  ;;  %v2391_v37 = vsel %vm2389_vm7, %v2390_v58, 0.0 }
 0xf1b   : > { %v2392_v60 = vadd.f32 %v2391_v37, %v2388_v59 }
 0xf1d   : > { %2393 = vst [vmem:[%s3526_s6] sm:$0xff] %v2392_v60 }
 0xf1e PF: > { %s3527_s26 = sld [smem:[#allocation5_spill]]  ;;  %s3528_s21 = sld [smem:[#allocation4_spill]] }
 0xf1f   : > { %s3529_s22 = sld [smem:[#allocation6_spill]] }
 0xf24   : > { %s26_s23 = sadd.s32 1, %s3527_s26  }
 0xf25   : > { %p23_p7 = scmp.ge.s32.totalorder %s26_s23, 4  }
 0xf27   :  { %25 = sbr.rel (!%p23_p7) target bundleno = 8 (0x8), region = 161 }

</bundles_post_ra>
